<compile_context>
chip_gen: v6e
topology: v6e:2x2x1
jax: 0.10.0
libtpu: 0.0.40
codegen_flags: <defaults>
</compile_context>

<pallas_src>
import jax
import jax.numpy as jnp
from jax import lax
from jax.experimental import pallas as pl
from jax.experimental.pallas import tpu as pltpu


def _forward_kernel(xpad_ref, wconv_ref, bconv_ref, w1_ref, b1_ref,
                    w2_ref, b2_ref, out_ref):
    TB, Hp, Wp, C = xpad_ref.shape
    H, W = Hp - 2, Wp - 2
    Cout = wconv_ref.shape[-1]
    n_classes = out_ref.shape[-1]

    xpad = xpad_ref[...]                                   # bf16 [TB, H+2, W+2, C]

    # --- Conv2d(3x3, pad=1) as a single im2col matmul on the MXU ---------
    # patch columns ordered (dy, dx, c) to match wconv_ref's [9*C, Cout].
    taps = [xpad[:, dy:dy + H, dx:dx + W, :]
            for dy in range(3) for dx in range(3)]
    patches = jnp.concatenate(taps, axis=-1)               # [TB, H, W, 9*C]
    patches = patches.reshape(TB * H * W, 9 * C)           # layout-preserving

    conv = jnp.dot(patches, wconv_ref[...],
                   preferred_element_type=jnp.float32)     # [TB*H*W, Cout] f32
    conv = jnp.maximum(conv + bconv_ref[...], 0.0)         # f32 epilogue

    # --- global average pool: spatial SUM only (1/(H*W) folded into w1) --
    pooled = jnp.sum(conv.reshape(TB, H * W, Cout), axis=1)  # [TB, Cout] f32

    # --- encoder head: Linear(Cout -> n_features) + ReLU -----------------
    h = jnp.dot(pooled.astype(w1_ref.dtype), w1_ref[...],
                preferred_element_type=jnp.float32)
    h = jnp.maximum(h + b1_ref[...], 0.0)                  # [TB, n_features] f32

    # --- classifier: Linear(n_features -> n_classes) ---------------------
    logits = jnp.dot(h.astype(w2_ref.dtype), w2_ref[...],
                     preferred_element_type=jnp.float32)
    out_ref[...] = (logits + b2_ref[...]).reshape(TB, 1, n_classes)


def incremental_adversarial_forward(x_nchw, params, *, batch_tile=1):
    """x_nchw: [B, C, H, W] float32 -> logits [B, n_classes]."""
    wconv_pt, bconv, w1, b1, w2, b2 = params               # wconv_pt: OIHW
    B, C, H, W = x_nchw.shape
    Cout = wconv_pt.shape[0]
    n_feat = w1.shape[-1]
    n_classes = w2.shape[-1]
    TB = batch_tile
    assert B % TB == 0, "batch_tile must divide batch"

    # glue: NCHW -> NHWC + 1px zero pad (one fused XLA copy), bf16 activations
    x_nhwc = jnp.transpose(x_nchw, (0, 2, 3, 1)).astype(jnp.bfloat16)
    x_pad = jnp.pad(x_nhwc, ((0, 0), (1, 1), (1, 1), (0, 0)))

    # conv weight OIHW -> im2col [(dy, dx, c), Cout], bf16 for the MXU
    w_im2col = jnp.transpose(wconv_pt, (2, 3, 1, 0)).reshape(9 * C, Cout)
    w_im2col = w_im2col.astype(jnp.bfloat16)
    # fold the mean-pool scale into the first dense layer
    w1_s = (w1 / float(H * W)).astype(jnp.bfloat16)
    w2_b = w2.astype(jnp.bfloat16)
    bconv2 = bconv.reshape(1, Cout).astype(jnp.float32)
    b1_2 = b1.reshape(1, n_feat).astype(jnp.float32)
    b2_2 = b2.reshape(1, n_classes).astype(jnp.float32)

    def resident(shape):
        # full-extent block with a constant index_map -> stays in VMEM
        return pl.BlockSpec(shape, lambda b, _s=shape: (0,) * len(_s))

    out = pl.pallas_call(
        _forward_kernel,
        out_shape=jax.ShapeDtypeStruct((B, 1, n_classes), jnp.float32),
        grid=(B // TB,),
        in_specs=[
            pl.BlockSpec((TB, H + 2, W + 2, C), lambda b: (b, 0, 0, 0)),
            resident((9 * C, Cout)),
            resident((1, Cout)),
            resident((Cout, n_feat)),
            resident((1, n_feat)),
            resident((n_feat, n_classes)),
            resident((1, n_classes)),
        ],
        out_specs=pl.BlockSpec((TB, 1, n_classes), lambda b: (b, 0, 0)),
        compiler_params=pltpu.CompilerParams(
            dimension_semantics=("parallel",),
            vmem_limit_bytes=32 * 1024 * 1024,
        ),
    )(x_pad, w_im2col, bconv2, w1_s, b1_2, w2_b, b2_2)
    return out.reshape(B, n_classes)


def _reference_forward(x_nchw, params):
    """Pure-JAX f32 reference matching the PyTorch module semantics."""
    wconv_pt, bconv, w1, b1, w2, b2 = params
    conv = lax.conv_general_dilated(
        x_nchw, wconv_pt, window_strides=(1, 1), padding="SAME",
        dimension_numbers=("NCHW", "OIHW", "NCHW"))
    conv = jax.nn.relu(conv + bconv.reshape(1, -1, 1, 1))
    pooled = conv.mean(axis=(2, 3))                         # [B, Cout]
    h = jax.nn.relu(pooled @ w1 + b1.reshape(1, -1))        # [B, n_features]
    return h @ w2 + b2.reshape(1, -1)                       # [B, n_classes]


def init_params(key, c_in=4, c_hid=8, n_features=32, n_classes=10):
    k = jax.random.split(key, 6)
    s = 0.1
    wconv = s * jax.random.normal(k[0], (c_hid, c_in, 3, 3), jnp.float32)
    bconv = s * jax.random.normal(k[1], (c_hid,), jnp.float32)
    w1 = s * jax.random.normal(k[2], (c_hid, n_features), jnp.float32)
    b1 = s * jax.random.normal(k[3], (n_features,), jnp.float32)
    w2 = s * jax.random.normal(k[4], (n_features, n_classes), jnp.float32)
    b2 = s * jax.random.normal(k[5], (n_classes,), jnp.float32)
    return (wconv, bconv, w1, b1, w2, b2)


if __name__ == "__main__":
    key = jax.random.PRNGKey(0)
    k_x, k_p = jax.random.split(key)

    B, C, H, W = 2, 4, 16, 16
    x = jax.random.normal(k_x, (B, C, H, W), jnp.float32)
    params = init_params(k_p, c_in=C, c_hid=8, n_features=32, n_classes=10)

    logits = jax.jit(incremental_adversarial_forward)(x, params)
    jax.block_until_ready(logits)

    ref = _reference_forward(x, params)
    assert logits.shape == (B, 10) and logits.dtype == jnp.float32
    assert jnp.allclose(logits, ref, atol=5e-2, rtol=5e-2), \
        f"max abs err {jnp.max(jnp.abs(logits - ref))}"
    print("KERNEL_OK")
</pallas_src>

<mosaic_0001>
module attributes {stable_mosaic.version = 11 : i64} {
  func.func @_forward_kernel(%arg0: i32, %arg1: memref<1x18x18x4xbf16, #tpu.memory_space<vmem>>, %arg2: memref<36x8xbf16, #tpu.memory_space<vmem>>, %arg3: memref<1x8xf32, #tpu.memory_space<vmem>>, %arg4: memref<8x32xbf16, #tpu.memory_space<vmem>>, %arg5: memref<1x32xf32, #tpu.memory_space<vmem>>, %arg6: memref<32x10xbf16, #tpu.memory_space<vmem>>, %arg7: memref<1x10xf32, #tpu.memory_space<vmem>>, %arg8: memref<1x1x10xf32, #tpu.memory_space<vmem>>) attributes {dimension_semantics = [#tpu.dimension_semantics<parallel>], iteration_bounds = array<i64: 2>, scalar_prefetch = 0 : i64, scratch_operands = 0 : i64, tpu.core_type = #tpu.core_type<tc>, window_params = [{transform_indices = @transform_0, window_bounds = array<i64: 1, 18, 18, 4>}, {pipeline_mode = #tpu.pipeline_mode<synchronous>, transform_indices = @transform_1, window_bounds = array<i64: 36, 8>}, {pipeline_mode = #tpu.pipeline_mode<synchronous>, transform_indices = @transform_2, window_bounds = array<i64: 1, 8>}, {pipeline_mode = #tpu.pipeline_mode<synchronous>, transform_indices = @transform_3, window_bounds = array<i64: 8, 32>}, {pipeline_mode = #tpu.pipeline_mode<synchronous>, transform_indices = @transform_4, window_bounds = array<i64: 1, 32>}, {pipeline_mode = #tpu.pipeline_mode<synchronous>, transform_indices = @transform_5, window_bounds = array<i64: 32, 10>}, {pipeline_mode = #tpu.pipeline_mode<synchronous>, transform_indices = @transform_6, window_bounds = array<i64: 1, 10>}, {transform_indices = @transform_7, window_bounds = array<i64: 1, 1, 10>}]} {
    %c0 = arith.constant 0 : index
    %c0_0 = arith.constant 0 : index
    %c0_1 = arith.constant 0 : index
    %c0_2 = arith.constant 0 : index
    %0 = vector.load %arg1[%c0, %c0_0, %c0_1, %c0_2] : memref<1x18x18x4xbf16, #tpu.memory_space<vmem>>, vector<1x18x18x4xbf16>
    %1 = vector.extract_strided_slice %0 {offsets = [0, 0, 0, 0], sizes = [1, 16, 16, 4], strides = [1, 1, 1, 1]} : vector<1x18x18x4xbf16> to vector<1x16x16x4xbf16>
    %2 = vector.extract_strided_slice %0 {offsets = [0, 0, 1, 0], sizes = [1, 16, 16, 4], strides = [1, 1, 1, 1]} : vector<1x18x18x4xbf16> to vector<1x16x16x4xbf16>
    %3 = vector.extract_strided_slice %0 {offsets = [0, 0, 2, 0], sizes = [1, 16, 16, 4], strides = [1, 1, 1, 1]} : vector<1x18x18x4xbf16> to vector<1x16x16x4xbf16>
    %4 = vector.extract_strided_slice %0 {offsets = [0, 1, 0, 0], sizes = [1, 16, 16, 4], strides = [1, 1, 1, 1]} : vector<1x18x18x4xbf16> to vector<1x16x16x4xbf16>
    %5 = vector.extract_strided_slice %0 {offsets = [0, 1, 1, 0], sizes = [1, 16, 16, 4], strides = [1, 1, 1, 1]} : vector<1x18x18x4xbf16> to vector<1x16x16x4xbf16>
    %6 = vector.extract_strided_slice %0 {offsets = [0, 1, 2, 0], sizes = [1, 16, 16, 4], strides = [1, 1, 1, 1]} : vector<1x18x18x4xbf16> to vector<1x16x16x4xbf16>
    %7 = vector.extract_strided_slice %0 {offsets = [0, 2, 0, 0], sizes = [1, 16, 16, 4], strides = [1, 1, 1, 1]} : vector<1x18x18x4xbf16> to vector<1x16x16x4xbf16>
    %8 = vector.extract_strided_slice %0 {offsets = [0, 2, 1, 0], sizes = [1, 16, 16, 4], strides = [1, 1, 1, 1]} : vector<1x18x18x4xbf16> to vector<1x16x16x4xbf16>
    %9 = vector.extract_strided_slice %0 {offsets = [0, 2, 2, 0], sizes = [1, 16, 16, 4], strides = [1, 1, 1, 1]} : vector<1x18x18x4xbf16> to vector<1x16x16x4xbf16>
    %10 = tpu.concatenate %1, %2, %3, %4, %5, %6, %7, %8, %9 in 3 : vector<1x16x16x4xbf16>, vector<1x16x16x4xbf16>, vector<1x16x16x4xbf16>, vector<1x16x16x4xbf16>, vector<1x16x16x4xbf16>, vector<1x16x16x4xbf16>, vector<1x16x16x4xbf16>, vector<1x16x16x4xbf16>, vector<1x16x16x4xbf16> -> vector<1x16x16x36xbf16>
    %11 = vector.shape_cast %10 : vector<1x16x16x36xbf16> to vector<256x36xbf16>
    %c0_3 = arith.constant 0 : index
    %c0_4 = arith.constant 0 : index
    %12 = vector.load %arg2[%c0_3, %c0_4] : memref<36x8xbf16, #tpu.memory_space<vmem>>, vector<36x8xbf16>
    %cst = arith.constant dense<0.000000e+00> : vector<256x8xf32>
    %13 = tpu.matmul %11, %12, %cst {dimension_numbers = #tpu.dot_dimension_numbers<[1], [0], [0], [1], [0, 0, 1, 1], [], []>} : vector<256x36xbf16>, vector<36x8xbf16>, vector<256x8xf32> -> vector<256x8xf32>
    %c0_5 = arith.constant 0 : index
    %c0_6 = arith.constant 0 : index
    %14 = vector.load %arg3[%c0_5, %c0_6] : memref<1x8xf32, #tpu.memory_space<vmem>>, vector<1x8xf32>
    %15 = vector.broadcast %14 : vector<1x8xf32> to vector<256x8xf32>
    %16 = arith.addf %13, %15 : vector<256x8xf32>
    %cst_7 = arith.constant 0.000000e+00 : f32
    %17 = vector.broadcast %cst_7 : f32 to vector<256x8xf32>
    %18 = arith.maximumf %16, %17 : vector<256x8xf32>
    %19 = vector.shape_cast %18 : vector<256x8xf32> to vector<1x256x8xf32>
    %cst_8 = arith.constant dense<0.000000e+00> : vector<1x8xf32>
    %20 = vector.multi_reduction <add>, %19, %cst_8 [1] : vector<1x256x8xf32> to vector<1x8xf32>
    %21 = arith.truncf %20 : vector<1x8xf32> to vector<1x8xbf16>
    %c0_9 = arith.constant 0 : index
    %c0_10 = arith.constant 0 : index
    %22 = vector.load %arg4[%c0_9, %c0_10] : memref<8x32xbf16, #tpu.memory_space<vmem>>, vector<8x32xbf16>
    %cst_11 = arith.constant dense<0.000000e+00> : vector<1x32xf32>
    %23 = tpu.matmul %21, %22, %cst_11 {dimension_numbers = #tpu.dot_dimension_numbers<[1], [0], [0], [1], [0, 0, 1, 1], [], []>} : vector<1x8xbf16>, vector<8x32xbf16>, vector<1x32xf32> -> vector<1x32xf32>
    %c0_12 = arith.constant 0 : index
    %c0_13 = arith.constant 0 : index
    %24 = vector.load %arg5[%c0_12, %c0_13] : memref<1x32xf32, #tpu.memory_space<vmem>>, vector<1x32xf32>
    %25 = arith.addf %23, %24 : vector<1x32xf32>
    %cst_14 = arith.constant 0.000000e+00 : f32
    %26 = vector.broadcast %cst_14 : f32 to vector<1x32xf32>
    %27 = arith.maximumf %25, %26 : vector<1x32xf32>
    %28 = arith.truncf %27 : vector<1x32xf32> to vector<1x32xbf16>
    %c0_15 = arith.constant 0 : index
    %c0_16 = arith.constant 0 : index
    %29 = vector.load %arg6[%c0_15, %c0_16] : memref<32x10xbf16, #tpu.memory_space<vmem>>, vector<32x10xbf16>
    %cst_17 = arith.constant dense<0.000000e+00> : vector<1x10xf32>
    %30 = tpu.matmul %28, %29, %cst_17 {dimension_numbers = #tpu.dot_dimension_numbers<[1], [0], [0], [1], [0, 0, 1, 1], [], []>} : vector<1x32xbf16>, vector<32x10xbf16>, vector<1x10xf32> -> vector<1x10xf32>
    %c0_18 = arith.constant 0 : index
    %c0_19 = arith.constant 0 : index
    %31 = vector.load %arg7[%c0_18, %c0_19] : memref<1x10xf32, #tpu.memory_space<vmem>>, vector<1x10xf32>
    %32 = arith.addf %30, %31 : vector<1x10xf32>
    %33 = vector.shape_cast %32 : vector<1x10xf32> to vector<1x1x10xf32>
    %c0_20 = arith.constant 0 : index
    %c0_21 = arith.constant 0 : index
    %c0_22 = arith.constant 0 : index
    %34 = vector.load %arg8[%c0_20, %c0_21, %c0_22] : memref<1x1x10xf32, #tpu.memory_space<vmem>>, vector<1x1x10xf32>
    tpu.vector_store %arg8[%c0_20, %c0_21, %c0_22], %33 {strides = array<i32>} : memref<1x1x10xf32, #tpu.memory_space<vmem>>, vector<1x1x10xf32>,
    return
  }
  func.func @transform_0(%arg0: i32) -> (i32, i32, i32, i32) {
    %c0_i32 = arith.constant 0 : i32
    %c0_i32_0 = arith.constant 0 : i32
    %c0_i32_1 = arith.constant 0 : i32
    %c0_i32_2 = arith.constant 0 : i32
    return %arg0, %c0_i32, %c0_i32_0, %c0_i32_1 : i32, i32, i32, i32
  }
  func.func @transform_1(%arg0: i32) -> (i32, i32) {
    %c0_i32 = arith.constant 0 : i32
    %c0_i32_0 = arith.constant 0 : i32
    %c0_i32_1 = arith.constant 0 : i32
    return %c0_i32, %c0_i32_0 : i32, i32
  }
  func.func @transform_2(%arg0: i32) -> (i32, i32) {
    %c0_i32 = arith.constant 0 : i32
    %c0_i32_0 = arith.constant 0 : i32
    %c0_i32_1 = arith.constant 0 : i32
    return %c0_i32, %c0_i32_0 : i32, i32
  }
  func.func @transform_3(%arg0: i32) -> (i32, i32) {
    %c0_i32 = arith.constant 0 : i32
    %c0_i32_0 = arith.constant 0 : i32
    %c0_i32_1 = arith.constant 0 : i32
    return %c0_i32, %c0_i32_0 : i32, i32
  }
  func.func @transform_4(%arg0: i32) -> (i32, i32) {
    %c0_i32 = arith.constant 0 : i32
    %c0_i32_0 = arith.constant 0 : i32
    %c0_i32_1 = arith.constant 0 : i32
    return %c0_i32, %c0_i32_0 : i32, i32
  }
  func.func @transform_5(%arg0: i32) -> (i32, i32) {
    %c0_i32 = arith.constant 0 : i32
    %c0_i32_0 = arith.constant 0 : i32
    %c0_i32_1 = arith.constant 0 : i32
    return %c0_i32, %c0_i32_0 : i32, i32
  }
  func.func @transform_6(%arg0: i32) -> (i32, i32) {
    %c0_i32 = arith.constant 0 : i32
    %c0_i32_0 = arith.constant 0 : i32
    %c0_i32_1 = arith.constant 0 : i32
    return %c0_i32, %c0_i32_0 : i32, i32
  }
  func.func @transform_7(%arg0: i32) -> (i32, i32, i32) {
    %c0_i32 = arith.constant 0 : i32
    %c0_i32_0 = arith.constant 0 : i32
    %c0_i32_1 = arith.constant 0 : i32
    return %arg0, %c0_i32, %c0_i32_0 : i32, i32, i32
  }
}

</mosaic_0001>

<bundles_post_ra>
// kernel: incremental_adversarial_forward.1
= control target key start
LH: loop header
LB: loop body
LE: loop exit
PB: predicated region body
PF: predicated region fallthrough
CT: control target
= control target key end

     0   :  { %12 = vsyncpa [#allocation3], 0  ;;  %s2810_s0 = inlined_call_operand.vmem [shape: bf16[2,18,18,4], index: 0, kind: input, shape index: {}]   ;;  %s2811_s1 = inlined_call_operand.vmem [shape: bf16[36,8], index: 1, kind: input, shape index: {}]   ;;  %s2812_s2 = inlined_call_operand.vmem [shape: f32[1,8], index: 2, kind: input, shape index: {}]   ;;  %s2813_s3 = inlined_call_operand.vmem [shape: bf16[8,32], index: 3, kind: input, shape index: {}]   ;;  %s2814_s4 = inlined_call_operand.vmem [shape: f32[1,32], index: 4, kind: input, shape index: {}]   ;;  %s2815_s5 = inlined_call_operand.vmem [shape: bf16[32,10], index: 5, kind: input, shape index: {}]   ;;  %s2816_s6 = inlined_call_operand.vmem [shape: f32[1,10], index: 6, kind: input, shape index: {}]   ;;  %s2817_s7 = inlined_call_operand.hbm [shape: f32[2,1,10], index: 7, kind: output, shape index: {}]  }
   0x1   :  { %14 = vsyncpa [#allocation3 + $0x1], 0  ;;  %s2131_s24 = smov 0   ;;  %s2133_s25 = smov 0  }
   0x2   :  { %s2135_s26 = smov 0   ;;  %s2137_s27 = smov 0  }
   0x3 LB: > { %s2152_s28 = sadd.s32 4294967295, %s2078_s27   ;;  %s1775_s29 = sadd.s32 4294967294, %s2078_s27   ;;  %s2078_s27 = sphi %s2137_s27, %s2823_s27   ;;  %s2074_s26 = sphi %s2135_s26, %s2822_s26   ;;  %s2070_s25 = sphi %s2133_s25, %s2821_s25   ;;  %s2066_s24 = sphi %s2131_s24, %s2820_s24  }
   0x4   : > { %s2156_s30 = sadd.s32 1, %s2078_s27   ;;  %s179_s8 = sadd.s32 1, %s2074_s26 }
   0x5   : > { %s176_s9 = ssub.s32 %s2078_s27, %s2156_s30  ;;  %p189_p0 = scmp.ne.s32.totalorder %s2074_s26, %s2070_s25 }
   0x6   : > { %p177_p1 = scmp.eq.s32.totalorder %s176_s9, 0  ;;  %p190_p2 = scmp.eq.s32.totalorder %s2152_s28, 1 }
   0x7   : > { %p195_p3 = scmp.ne.s32.totalorder %s2070_s25, %s2066_s24  ;;  %p196_p4 = scmp.eq.s32.totalorder %s1775_s29, 1 }
   0x8   : > { %s2167_s10 = scalar_select %p177_p1, %s2074_s26, %s179_s8  }
   0x9   : > { %p2169_p5 = por %p190_p2, %p189_p0  ;;  %p2173_p6 = por %p196_p4, %p195_p3 }
   0xa   : > { %p1778_p7 = scmp.ge.s32.totalorder %s2078_s27, 1  ;;  %p240_p8 = scmp.lt.s32.totalorder %s2078_s27, 3 }
   0xc   : > { %p241_p9 = pnand %p1778_p7, %p240_p8 }
   0xd   : > { %p271_p10 = scmp.lt.s32.totalorder (!%p241_p9), %s2152_s28, 1  ;;  %s2080_s18 = smov (!%p241_p9), 12  }
   0xe   : > { %244 = sbr.rel (%p241_p9) target bundleno = 1026 (0x402), region = 48  ;;  %s2081_s19 = smov (!%p241_p9), 20  }
   0xf   : > { %s2082_s20 = smov (!%p241_p9), 8   ;;  %s2083_s21 = smov (!%p241_p9), 4  }
  0x10   : > { %s2084_s22 = smov (!%p241_p9), 16   ;;  %s2085_s23 = smov (!%p241_p9), 24  }
  0x11   : > { %s2086_s29 = smov (!%p241_p9), 28   ;;  %s2087_s15 = smov (!%p241_p9), 32  }
  0x12   : > { %s1840_s8 = sshll.u32 (!%p241_p9), %s2152_s28, 4 }
  0x13   : > { %s272_s13 = scalar_select %p271_p10, %s2152_s28, 1  ;;  %vm684_vm0 = vcmask 1046528   ;;  %vm459_vm1 = vsmask.f32 7424  ;;  %v1999_v49 = vld [vmem:[%s2811_s1 + $0x8] sm:$0xff]   ;;  %vm1327_vm2 = vcmask 1041408  }
  0x14   : > { %v1997_v45 = vld [vmem:[%s2811_s1 + $0x10] ss:$0 sps:$4 sm:$0x33]   ;;  %v2001_v54 = vld [vmem:[%s2811_s1] sm:$0xff]   ;;  %vm1003_vm3 = vcmask 31744   ;;  %vm1036_vm4 = vcmask 64512  }
  0x15   : > { %s1927_s14 = smul.u32 216, %s272_s13  ;;  %1925 = vmatprep.subr.msk.bf16.mxu0 %vm1327_vm2, %v1997_v45  ;;  %v1329_v50 = vsel %vm1327_vm2, %v1997_v45, 0  ;;  %1926 = vmatprep.subr.msk.bf16.mxu1 %vm1327_vm2, %v1997_v45  ;;  %vm1069_vm5 = vcmask 97280   ;;  %vm1102_vm6 = vcmask 130048   ;;  %vm1135_vm7 = vcmask 162816  }
  0x16   : > { %1868 = vmatpush3.bf16.msra.mxu0 %v1329_v50  ;;  %1922 = vmatpush3.bf16.msra.mxu1 %v1329_v50  ;;  %vm1168_vm8 = vcmask 195584   ;;  %vm1201_vm9 = vcmask 228352   ;;  %vm1234_vm10 = vcmask 261120   ;;  %vm1294_vm11 = vcmask 293888  }
  0x17   : > { %s2184_s17 = scalar_lea.vmem %s2810_s0, %s1927_s14  ;;  %1869 = vmatprep.subr.bf16.mxu0 %v1999_v49  ;;  %1920 = vmatprep.subr.bf16.mxu1 %v1999_v49  ;;  %vm1599_vm12 = vcmask 1043456   ;;  %vm2089_vm13 = vmmov 0   ;;  %s269_s14 = sand.u32 1, %s2070_s25   ;;  %vm1705_vm14 = vcmask 73728  }
  0x18   : > { %v2187_v0 = vld [vmem:[%s2184_s17 + $0x18] sm:$0xff]   ;;  %v2190_v1 = vld [vmem:[%s2184_s17 + $0xc] sm:$0xff]   ;;  %v1979_v2 = vld [vmem:[%s2184_s17 + $0x14] ss:$0 sps:$4 sm:$0x11]  }
  0x19   : > { %772 = vrot.lane.b32.xlu1 %v2187_v0, %s2080_s18  ;;  %v2196_v3 = vld [vmem:[%s2184_s17] sm:$0xff]   ;;  %770 = vrot.lane.b32.xlu0 %v2190_v1, %s2080_s18  ;;  %v688_v4 = vrot.slane %v2190_v1, 1  ;;  %v689_v5 = vrot.slane %v1979_v2, 1  ;;  %v1981_v6 = vld [vmem:[%s2184_s17 + $0x8] ss:$0 sps:$4 sm:$0x11]  }
  0x1a   : > { %v685_v7 = vrot.slane %v2196_v3, 1  ;;  %v461_v8 = vshrl.u32 %v2196_v3, 16  ;;  %v463_v9 = vshll.u32 %v2196_v3, 16  ;;  %v473_v10 = vshrl.u32 %v2190_v1, 16  ;;  %v2216_v30 = vld [vmem:[%s2184_s17 + $0x24] sm:$0xff]   ;;  %v2243_v48 = vld [vmem:[%s2184_s17 + $0x30] sm:$0xff]   ;;  %1870 = vmatpush3.bf16.msra.mxu0 %v1999_v49  ;;  %1923 = vmatpush3.bf16.msra.mxu1 %v1999_v49 }
  0x1b   : > { %v690_v11 = vsel %vm684_vm0, %v688_v4, %v689_v5  ;;  %v686_v12 = vrot.slane %v1981_v6, 1  ;;  %v468_v13 = vshll.u32 %v1981_v6, 16  ;;  %v1982_v14 = vld [vmem:[%s2184_s17 + $0x20] ss:$0 sps:$4 sm:$0x11]   ;;  %v475_v15 = vshll.u32 %v2190_v1, 16  ;;  %1871 = vmatprep.subr.bf16.mxu0 %v2001_v54  ;;  %1921 = vmatprep.subr.bf16.mxu1 %v2001_v54 }
  0x1c   : > { %v465_v16 = vrot.slane %v463_v9, 1  ;;  %v480_v17 = vshll.u32 %v1979_v2, 16  ;;  %v487_v18 = vshll.u32 %v2187_v0, 16  ;;  %v691_v23 = vrot.slane %v2187_v0, 1  ;;  %v2262_v60 = vld [vmem:[%s2184_s17 + $0x3c] sm:$0xff]   ;;  %v2338_v49 = vld [vmem:[%s2184_s17 + $0x6c] sm:$0xff]  }
  0x1d   : > { %852 = vrot.lane.b32.xlu0 %v690_v11, %s2081_s19  ;;  %v687_v19 = vsel %vm684_vm0, %v685_v7, %v686_v12  ;;  %v470_v20 = vrot.slane %v468_v13, 1  ;;  %v477_v21 = vrot.slane %v475_v15, 1  ;;  %v485_v25 = vshrl.u32 %v2187_v0, 16  ;;  %v1984_v33 = vld [vmem:[%s2184_s17 + $0x2c] ss:$0 sps:$4 sm:$0x11]  }
  0x1e   : > { %733 = vrot.lane.b32.xlu1 %v687_v19, %s2082_s20  ;;  %v466_v22 = vor.u32 %v465_v16, %v461_v8  ;;  %v482_v24 = vrot.slane %v480_v17, 1  ;;  %v692_v26 = vrot.slane %v1982_v14, 1  ;;  %v489_v28 = vrot.slane %v487_v18, 1  ;;  %v1986_v52 = vld [vmem:[%s2184_s17 + $0x38] ss:$0 sps:$4 sm:$0x11]   ;;  %1872 = vmatpush3.bf16.msra.mxu0 %v2001_v54 }
  0x1f   : > { %v478_v27 = vor.u32 %v477_v21, %v473_v10  ;;  %v492_v29 = vshll.u32 %v1982_v14, 16  ;;  %v499_v37 = vshll.u32 %v2216_v30, 16  ;;  %v497_v39 = vshrl.u32 %v2216_v30, 16  ;;  %1924 = vmatpush3.bf16.msra.mxu1 %v2001_v54  ;;  %v1988_v2 = vld [vmem:[%s2184_s17 + $0x44] ss:$0 sps:$4 sm:$0x11]  }
  0x20   : > { %v471_v31 = vsel %vm459_vm1, %v466_v22, %v470_v20  ;;  %v693_v34 = vsel %vm684_vm0, %v691_v23, %v692_v26  ;;  %v490_v35 = vor.u32 %v489_v28, %v485_v25  ;;  %v504_v41 = vshll.u32 %v1984_v33, 16  ;;  %v2287_v14 = vld [vmem:[%s2184_s17 + $0x48] sm:$0xff]   ;;  %v1990_v16 = vld [vmem:[%s2184_s17 + $0x50] ss:$0 sps:$4 sm:$0x11]   ;;  %v2300_v23 = vld [vmem:[%s2184_s17 + $0x54] sm:$0xff]  }
  0x21   : > { %652 = vrot.lane.b32.xlu0 %v471_v31, %s2083_s21  ;;  %v483_v32 = vsel %vm459_vm1, %v478_v27, %v482_v24  ;;  %v494_v36 = vrot.slane %v492_v29, 1  ;;  %v501_v40 = vrot.slane %v499_v37, 1  ;;  %v694_v46 = vrot.slane %v2216_v30, 1  ;;  %v1992_v27 = vld [vmem:[%s2184_s17 + $0x5c] ss:$0 sps:$4 sm:$0x11]  }
  0x22   : > { %735 = vrot.lane.b32.xlu1 %v690_v11, %s2082_s20  ;;  %v506_v43 = vrot.slane %v504_v41, 1  ;;  %v695_v47 = vrot.slane %v1984_v33, 1  ;;  %v511_v53 = vshll.u32 %v2243_v48, 16  ;;  %v509_v55 = vshrl.u32 %v2243_v48, 16 }
  0x23   : > { %v495_v38 = vsel %vm459_vm1, %v490_v35, %v494_v36  ;;  %v502_v42 = vor.u32 %v501_v40, %v497_v39  ;;  %v516_v57 = vshll.u32 %v1986_v52, 16  ;;  %v697_v62 = vrot.slane %v2243_v48, 1  ;;  %v2325_v39 = vld [vmem:[%s2184_s17 + $0x60] sm:$0xff]   ;;  %v1994_v41 = vld [vmem:[%s2184_s17 + $0x68] ss:$0 sps:$4 sm:$0x11]  }
  0x24   : > { %v696_v51 = vsel %vm684_vm0, %v694_v46, %v695_v47  ;;  %v513_v56 = vrot.slane %v511_v53, 1  ;;  %v698_v63 = vrot.slane %v1986_v52, 1  ;;  %v523_v4 = vshll.u32 %v2262_v60, 16  ;;  %v1996_v53 = vld [vmem:[%s2184_s17 + $0x74] ss:$0 sps:$4 sm:$0x11]  }
  0x25   : > { %654 = vrot.lane.b32.xlu0 %v483_v32, %s2083_s21  ;;  %v507_v44 = vsel %vm459_vm1, %v502_v42, %v506_v43  ;;  %v518_v59 = vrot.slane %v516_v57, 1  ;;  %v521_v6 = vshrl.u32 %v2262_v60, 16  ;;  %v528_v8 = vshll.u32 %v1988_v2, 16 }
  0x26   : > { %854 = vrot.lane.b32.xlu1 %v693_v34, %s2081_s19  ;;  %v514_v58 = vor.u32 %v513_v56, %v509_v55  ;;  %v699_v5 = vsel %vm684_vm0, %v697_v62, %v698_v63  ;;  %v525_v7 = vrot.slane %v523_v4, 1  ;;  %v700_v12 = vrot.slane %v2262_v60, 1 }
  0x27   : > { %v530_v10 = vrot.slane %v528_v8, 1  ;;  %v701_v13 = vrot.slane %v1988_v2, 1  ;;  %v535_v17 = vshll.u32 %v2287_v14, 16  ;;  %v533_v18 = vshrl.u32 %v2287_v14, 16 }
  0x28   : > { %v519_v61 = vsel %vm459_vm1, %v514_v58, %v518_v59  ;;  %v526_v9 = vor.u32 %v525_v7, %v521_v6  ;;  %v540_v20 = vshll.u32 %v1990_v16, 16  ;;  %v703_v25 = vrot.slane %v2287_v14, 1 }
  0x29   : > { %817 = vrot.lane.b32.xlu0 %v483_v32, %s2084_s22  ;;  %v702_v15 = vsel %vm684_vm0, %v700_v12, %v701_v13  ;;  %v537_v19 = vrot.slane %v535_v17, 1  ;;  %v704_v26 = vrot.slane %v1990_v16, 1  ;;  %v547_v28 = vshll.u32 %v2300_v23, 16  ;;  %v2000_v13 = vld [vmem:[%s2184_s17 + $0x80] ss:$0 sps:$4 sm:$0x11]  }
  0x2a   : > { %819 = vrot.lane.b32.xlu1 %v495_v38, %s2084_s22  ;;  %v531_v11 = vsel %vm459_vm1, %v526_v9, %v530_v10  ;;  %v542_v22 = vrot.slane %v540_v20, 1  ;;  %v545_v31 = vshrl.u32 %v2300_v23, 16  ;;  %v552_v33 = vshll.u32 %v1992_v27, 16  ;;  %v2363_v9 = vld [vmem:[%s2184_s17 + $0x78] sm:$0xff]  }
  0x2b   : > { %v538_v21 = vor.u32 %v537_v19, %v533_v18  ;;  %v705_v29 = vsel %vm684_vm0, %v703_v25, %v704_v26  ;;  %v549_v32 = vrot.slane %v547_v28, 1  ;;  %v706_v37 = vrot.slane %v2300_v23, 1  ;;  %v2381_v28 = vld [vmem:[%s2184_s17 + $0x84] sm:$0xff]  }
  0x2c   : > { %v554_v35 = vrot.slane %v552_v33, 1  ;;  %v559_v42 = vshll.u32 %v2325_v39, 16  ;;  %v557_v43 = vshrl.u32 %v2325_v39, 16  ;;  %v564_v45 = vshll.u32 %v1994_v41, 16 }
  0x2d   : > { %889 = vrot.lane.b32.xlu0 %v2187_v0, %s2085_s23  ;;  %v543_v24 = vsel %vm459_vm1, %v538_v21, %v542_v22  ;;  %v710_v52 = vrot.slane %v1994_v41, 1  ;;  %v571_v54 = vshll.u32 %v2338_v49, 16  ;;  %v569_v56 = vshrl.u32 %v2338_v49, 16 }
  0x2e   : > { %891 = vrot.lane.b32.xlu1 %v2216_v30, %s2085_s23  ;;  %v566_v47 = vrot.slane %v564_v45, 1  ;;  %v576_v58 = vshll.u32 %v1996_v53, 16  ;;  %v712_v6 = vrot.slane %v2338_v49, 1  ;;  %v713_v7 = vrot.slane %v1996_v53, 1 }
  0x2f   : > { %v573_v57 = vrot.slane %v571_v54, 1  ;;  %v581_v19 = vshrl.u32 %v2363_v9, 16  ;;  %v588_v21 = vshll.u32 %v2000_v13, 16  ;;  %v715_v33 = vrot.slane %v2363_v9, 1 }
  0x30   : > { %v578_v63 = vrot.slane %v576_v58, 1  ;;  %v593_v45 = vshrl.u32 %v2381_v28, 16 }
  0x31   : > { %936 = vrot.lane.b32.xlu0 %v495_v38, %s2086_s29  ;;  %v574_v62 = vor.u32 %v573_v57, %v569_v56 }
  0x32   : > { %938 = vrot.lane.b32.xlu1 %v507_v44, %s2086_s29 }
  0x33   : > { %v579_v4 = vsel %vm459_vm1, %v574_v62, %v578_v63 }
  0x35   : > { %971 = vrot.lane.b32.xlu0 %v693_v34, %s2087_s15 }
  0x36   : > { %656 = vrot.lane.b32.xlu1 %v495_v38, %s2083_s21  ;;  %v707_v38 = vrot.slane %v1992_v27, 1 }
  0x38   : > { %v708_v40 = vsel %vm684_vm0, %v706_v37, %v707_v38  ;;  %v716_v37 = vrot.slane %v2000_v13, 1  ;;  %v2003_v38 = vld [vmem:[%s2184_s17 + $0x8c] ss:$0 sps:$4 sm:$0x11]  }
  0x39   : > { %973 = vrot.lane.b32.xlu0 %v696_v51, %s2087_s15 }
  0x3a   : > { %658 = vrot.lane.b32.xlu1 %v507_v44, %s2083_s21 }
  0x3d   : > { %737 = vrot.lane.b32.xlu0 %v693_v34, %s2082_s20  ;;  %v550_v34 = vor.u32 %v549_v32, %v545_v31 }
  0x3e   : > { %739 = vrot.lane.b32.xlu1 %v696_v51, %s2082_s20 }
  0x3f   : > { %v555_v36 = vsel %vm459_vm1, %v550_v34, %v554_v35 }
  0x41   : > { %774 = vrot.lane.b32.xlu0 %v2216_v30, %s2080_s18 }
  0x42   : > { %776 = vrot.lane.b32.xlu1 %v2243_v48, %s2080_s18 }
  0x45   : > { %821 = vrot.lane.b32.xlu0 %v507_v44, %s2084_s22  ;;  %v561_v44 = vrot.slane %v559_v42, 1 }
  0x46   : > { %823 = vrot.lane.b32.xlu1 %v519_v61, %s2084_s22 }
  0x47   : > { %v562_v46 = vor.u32 %v561_v44, %v557_v43 }
  0x49   : > { %856 = vrot.lane.b32.xlu0 %v696_v51, %s2081_s19  ;;  %v567_v50 = vsel %vm459_vm1, %v562_v46, %v566_v47  ;;  %v709_v51 = vrot.slane %v2325_v39, 1 }
  0x4a   : > { %858 = vrot.lane.b32.xlu1 %v699_v5, %s2081_s19 }
  0x4b   : > { %v711_v55 = vsel %vm684_vm0, %v709_v51, %v710_v52  ;;  %v600_v52 = vshll.u32 %v2003_v38, 16 }
  0x4d   : > { %893 = vrot.lane.b32.xlu0 %v2243_v48, %s2085_s23 }
  0x4e   : > { %895 = vrot.lane.b32.xlu1 %v2262_v60, %s2085_s23 }
  0x51   : > { %940 = vrot.lane.b32.xlu0 %v519_v61, %s2086_s29 }
  0x52   : > { %942 = vrot.lane.b32.xlu1 %v531_v11, %s2086_s29 }
  0x55   : > { %975 = vrot.lane.b32.xlu0 %v699_v5, %s2087_s15 }
  0x56   : > { %660 = vrot.lane.b32.xlu1 %v519_v61, %s2083_s21 }
  0x59   : > { %977 = vrot.lane.b32.xlu0 %v702_v15, %s2087_s15 }
  0x5a   : > { %662 = vrot.lane.b32.xlu1 %v531_v11, %s2083_s21 }
  0x5d   : > { %741 = vrot.lane.b32.xlu0 %v699_v5, %s2082_s20 }
  0x5e   : > { %743 = vrot.lane.b32.xlu1 %v702_v15, %s2082_s20 }
  0x61   : > { %778 = vrot.lane.b32.xlu0 %v2262_v60, %s2080_s18 }
  0x62   : > { %780 = vrot.lane.b32.xlu1 %v2287_v14, %s2080_s18 }
  0x65   : > { %825 = vrot.lane.b32.xlu0 %v531_v11, %s2084_s22  ;;  %v714_v11 = vsel %vm684_vm0, %v712_v6, %v713_v7  ;;  %v718_v6 = vrot.slane %v2381_v28, 1  ;;  %v719_v7 = vrot.slane %v2003_v38, 1 }
  0x66   : > { %827 = vrot.lane.b32.xlu1 %v543_v24, %s2084_s22 }
  0x69   : > { %860 = vrot.lane.b32.xlu0 %v702_v15, %s2081_s19  ;;  %v583_v15 = vshll.u32 %v2363_v9, 16 }
  0x6a   : > { %862 = vrot.lane.b32.xlu1 %v705_v29, %s2081_s19 }
  0x6b   : > { %v585_v20 = vrot.slane %v583_v15, 1  ;;  %v2005_v15 = vld [vmem:[%s2184_s17 + $0x98] ss:$0 sps:$4 sm:$0x11]  }
  0x6d   : > { %897 = vrot.lane.b32.xlu0 %v2287_v14, %s2085_s23  ;;  %v586_v27 = vor.u32 %v585_v20, %v581_v19 }
  0x6e   : > { %899 = vrot.lane.b32.xlu1 %v2300_v23, %s2085_s23 }
  0x71   : > { %944 = vrot.lane.b32.xlu0 %v543_v24, %s2086_s29 }
  0x72   : > { %946 = vrot.lane.b32.xlu1 %v555_v36, %s2086_s29 }
  0x75   : > { %979 = vrot.lane.b32.xlu0 %v705_v29, %s2087_s15 }
  0x76   : > { %664 = vrot.lane.b32.xlu1 %v543_v24, %s2083_s21 }
  0x79   : > { %981 = vrot.lane.b32.xlu0 %v708_v40, %s2087_s15 }
  0x7a   : > { %666 = vrot.lane.b32.xlu1 %v555_v36, %s2083_s21 }
  0x7d   : > { %745 = vrot.lane.b32.xlu0 %v705_v29, %s2082_s20 }
  0x7e   : > { %747 = vrot.lane.b32.xlu1 %v708_v40, %s2082_s20 }
  0x81   : > { %782 = vrot.lane.b32.xlu0 %v2300_v23, %s2080_s18 }
  0x82   : > { %784 = vrot.lane.b32.xlu1 %v2325_v39, %s2080_s18 }
  0x85   : > { %829 = vrot.lane.b32.xlu0 %v555_v36, %s2084_s22 }
  0x86   : > { %831 = vrot.lane.b32.xlu1 %v567_v50, %s2084_s22 }
  0x89   : > { %864 = vrot.lane.b32.xlu0 %v708_v40, %s2081_s19  ;;  %v595_v40 = vshll.u32 %v2381_v28, 16 }
  0x8a   : > { %866 = vrot.lane.b32.xlu1 %v711_v55, %s2081_s19 }
  0x8b   : > { %v773_v59 = vpop.permute.xlu1 %772  ;;  %v771_v61 = vpop.permute.xlu0 %770  ;;  %v597_v51 = vrot.slane %v595_v40, 1 }
  0x8d   : > { %901 = vrot.lane.b32.xlu0 %v2325_v39, %s2085_s23 }
  0x8e   : > { %903 = vrot.lane.b32.xlu1 %v2338_v49, %s2085_s23 }
  0x8f   : > { %v853_v2 = vpop.permute.xlu0 %852 }
  0x90   : > { %v734_v5 = vpop.permute.xlu1 %733 }
  0x91   : > { %948 = vrot.lane.b32.xlu0 %v567_v50, %s2086_s29 }
  0x92   : > { %950 = vrot.lane.b32.xlu1 %v579_v4, %s2086_s29 }
  0x93   : > { %v653_v8 = vpop.permute.xlu0 %652 }
  0x94   : > { %v736_v10 = vpop.permute.xlu1 %735  ;;  %v1005_v17 = vsel %vm1003_vm3, %v2196_v3, %v653_v8  ;;  %v590_v3 = vrot.slane %v588_v21, 1  ;;  %v612_v21 = vshll.u32 %v2005_v15, 16 }
  0x95   : > { %983 = vrot.lane.b32.xlu0 %v711_v55, %s2087_s15  ;;  %v1038_v25 = vsel %vm1036_vm4, %v1005_v17, %v734_v5 }
  0x96   : > { %668 = vrot.lane.b32.xlu1 %v567_v50, %s2083_s21  ;;  %v1071_v32 = vsel %vm1069_vm5, %v1038_v25, %v771_v61  ;;  %v591_v36 = vsel %vm459_vm1, %v586_v27, %v590_v3  ;;  %v717_v50 = vsel %vm684_vm0, %v715_v33, %v716_v37  ;;  %v602_v61 = vrot.slane %v600_v52, 1  ;;  %v2434_v27 = vld [vmem:[%s2184_s17 + $0x9c] sm:$0xff]  }
  0x97   : > { %v655_v12 = vpop.permute.xlu0 %654  ;;  %v619_v37 = vshll.u32 %v2434_v27, 16 }
  0x98   : > { %v855_v16 = vpop.permute.xlu1 %854  ;;  %v1007_v24 = vsel %vm1003_vm3, %v2190_v1, %v655_v12  ;;  %v720_v12 = vsel %vm684_vm0, %v718_v6, %v719_v7  ;;  %v724_v6 = vrot.slane %v2434_v27, 1 }
  0x99   : > { %985 = vrot.lane.b32.xlu0 %v714_v11, %s2087_s15  ;;  %v1040_v29 = vsel %vm1036_vm4, %v1007_v24, %v736_v10  ;;  %v2421_v10 = vld [vmem:[%s2184_s17 + $0x90] sm:$0xff]  }
  0x9a   : > { %670 = vrot.lane.b32.xlu1 %v579_v4, %s2083_s21  ;;  %v1073_v34 = vsel %vm1069_vm5, %v1040_v29, %v773_v59  ;;  %v598_v59 = vor.u32 %v597_v51, %v593_v45  ;;  %v605_v19 = vshrl.u32 %v2421_v10, 16  ;;  %v617_v45 = vshrl.u32 %v2434_v27, 16 }
  0x9b   : > { %v818_v18 = vpop.permute.xlu0 %817 }
  0x9c   : > { %v820_v22 = vpop.permute.xlu1 %819  ;;  %v1104_v1 = vsel %vm1102_vm6, %v1071_v32, %v818_v18  ;;  %v721_v32 = vrot.slane %v2421_v10, 1 }
  0x9d   : > { %749 = vrot.lane.b32.xlu0 %v711_v55, %s2082_s20  ;;  %v1137_v42 = vsel %vm1135_vm7, %v1104_v1, %v853_v2  ;;  %v1106_v43 = vsel %vm1102_vm6, %v1073_v34, %v820_v22  ;;  %v722_v1 = vrot.slane %v2005_v15, 1 }
  0x9e   : > { %751 = vrot.lane.b32.xlu1 %v714_v11, %s2082_s20  ;;  %v1139_v55 = vsel %vm1135_vm7, %v1106_v43, %v855_v16  ;;  %v607_v16 = vshll.u32 %v2421_v10, 16 }
  0x9f   : > { %v890_v26 = vpop.permute.xlu0 %889 }
  0xa0   : > { %v892_v31 = vpop.permute.xlu1 %891  ;;  %v1170_v44 = vsel %vm1168_vm8, %v1137_v42, %v890_v26  ;;  %v609_v20 = vrot.slane %v607_v16, 1  ;;  %v614_v26 = vrot.slane %v612_v21, 1  ;;  %v2009_v16 = vld [vmem:[%s2184_s17 + $0xb0] ss:$0 sps:$4 sm:$0x11]  }
  0xa1   : > { %786 = vrot.lane.b32.xlu0 %v2338_v49, %s2080_s18  ;;  %v1172_v56 = vsel %vm1168_vm8, %v1139_v55, %v892_v31 }
  0xa2   : > { %788 = vrot.lane.b32.xlu1 %v2363_v9, %s2080_s18  ;;  %v610_v25 = vor.u32 %v609_v20, %v605_v19 }
  0xa3   : > { %v937_v35 = vpop.permute.xlu0 %936 }
  0xa4   : > { %v939_v41 = vpop.permute.xlu1 %938  ;;  %v1203_v46 = vsel %vm1201_vm9, %v1170_v44, %v937_v35  ;;  %v615_v35 = vsel %vm459_vm1, %v610_v25, %v614_v26  ;;  %v723_v44 = vsel %vm684_vm0, %v721_v32, %v722_v1 }
  0xa5   : > { %833 = vrot.lane.b32.xlu0 %v579_v4, %s2084_s22  ;;  %v1205_v57 = vsel %vm1201_vm9, %v1172_v56, %v939_v41  ;;  %v603_v4 = vsel %vm459_vm1, %v598_v59, %v602_v61 }
  0xa6   : > { %835 = vrot.lane.b32.xlu1 %v591_v36, %s2084_s22 }
  0xa7   : > { %v972_v47 = vpop.permute.xlu0 %971 }
  0xa8   : > { %v657_v53 = vpop.permute.xlu1 %656  ;;  %v1236_v54 = vsel %vm1234_vm10, %v1203_v46, %v972_v47 }
  0xa9   : > { %868 = vrot.lane.b32.xlu0 %v714_v11, %s2081_s19  ;;  %1873 = vmatprep.mubr.msk.bf16.mxu0 %vm1294_vm11, %v1236_v54  ;;  %v1009_v29 = vsel %vm1003_vm3, %v2187_v0, %v657_v53 }
  0xaa   : > { %870 = vrot.lane.b32.xlu1 %v717_v50, %s2081_s19 }
  0xab   : > { %v974_v58 = vpop.permute.xlu0 %973 }
  0xac   : > { %v659_v62 = vpop.permute.xlu1 %658  ;;  %v1238_v63 = vsel %vm1234_vm10, %v1205_v57, %v974_v58 }
  0xad   : > { %905 = vrot.lane.b32.xlu0 %v2363_v9, %s2085_s23  ;;  %1874 = vmatmul.mubr.msk.bf16.vlgmr.msra.gmra.mxu0 %vm1294_vm11, %v1238_v63  ;;  %v1011_v40 = vsel %vm1003_vm3, %v2216_v30, %v659_v62  ;;  %v621_v30 = vrot.slane %v619_v37, 1 }
  0xae   : > { %907 = vrot.lane.b32.xlu1 %v2381_v28, %s2085_s23 }
  0xaf   : > { %v738_v2 = vpop.permute.xlu0 %737  ;;  %v622_v59 = vor.u32 %v621_v30, %v617_v45 }
  0xb0   : > { %v740_v5 = vpop.permute.xlu1 %739  ;;  %v1042_v31 = vsel %vm1036_vm4, %v1009_v29, %v738_v2  ;;  %v2492_v29 = vld [vmem:[%s2184_s17 + $0xb4] sm:$0xff]  }
  0xb1   : > { %952 = vrot.lane.b32.xlu0 %v591_v36, %s2086_s29  ;;  %v1044_v42 = vsel %vm1036_vm4, %v1011_v40, %v740_v5 }
  0xb2   : > { %954 = vrot.lane.b32.xlu1 %v603_v4, %s2086_s29 }
  0xb3   : > { %v775_v8 = vpop.permute.xlu0 %774 }
  0xb4   : > { %v777_v11 = vpop.permute.xlu1 %776  ;;  %v1075_v33 = vsel %vm1069_vm5, %v1042_v31, %v775_v8 }
  0xb5   : > { %987 = vrot.lane.b32.xlu0 %v717_v50, %s2087_s15  ;;  %v1077_v46 = vsel %vm1069_vm5, %v1044_v42, %v777_v11  ;;  %v2479_v11 = vld [vmem:[%s2184_s17 + $0xa8] sm:$0xff]  }
  0xb6   : > { %672 = vrot.lane.b32.xlu1 %v591_v36, %s2083_s21  ;;  %v2007_v36 = vld [vmem:[%s2184_s17 + $0xa4] ss:$0 sps:$4 sm:$0x11]   ;;  %v629_v20 = vshrl.u32 %v2479_v11, 16 }
  0xb7   : > { %v822_v13 = vpop.permute.xlu0 %821  ;;  %v624_v51 = vshll.u32 %v2007_v36, 16  ;;  %v725_v7 = vrot.slane %v2007_v36, 1 }
  0xb8   : > { %v824_v17 = vpop.permute.xlu1 %823  ;;  %v1108_v0 = vsel %vm1102_vm6, %v1075_v33, %v822_v13  ;;  %v727_v33 = vrot.slane %v2479_v11, 1 }
  0xb9   : > { %989 = vrot.lane.b32.xlu0 %v720_v12, %s2087_s15  ;;  %v1110_v52 = vsel %vm1102_vm6, %v1077_v46, %v824_v17  ;;  %v626_v61 = vrot.slane %v624_v51, 1  ;;  %v726_v13 = vsel %vm684_vm0, %v724_v6, %v725_v7  ;;  %v631_v17 = vshll.u32 %v2479_v11, 16 }
  0xba   : > { %674 = vrot.lane.b32.xlu1 %v603_v4, %s2083_s21  ;;  %v641_v46 = vshrl.u32 %v2492_v29, 16  ;;  %v730_v6 = vrot.slane %v2492_v29, 1 }
  0xbb   : > { %v857_v18 = vpop.permute.xlu0 %856  ;;  %v633_v21 = vrot.slane %v631_v17, 1  ;;  %v2013_v17 = vld [vmem:[%s2184_s17 + $0xc8] ss:$0 sps:$4 sm:$0x11]  }
  0xbc   : > { %v859_v22 = vpop.permute.xlu1 %858  ;;  %v1141_v41 = vsel %vm1135_vm7, %v1108_v0, %v857_v18  ;;  %v2011_v0 = vld [vmem:[%s2184_s17 + $0xbc] ss:$0 sps:$4 sm:$0x11]  }
  0xbd   : > { %753 = vrot.lane.b32.xlu0 %v717_v50, %s2082_s20  ;;  %v1143_v55 = vsel %vm1135_vm7, %v1110_v52, %v859_v22  ;;  %v636_v22 = vshll.u32 %v2009_v16, 16  ;;  %v634_v26 = vor.u32 %v633_v21, %v629_v20  ;;  %v648_v51 = vshll.u32 %v2011_v0, 16 }
  0xbe   : > { %755 = vrot.lane.b32.xlu1 %v720_v12, %s2082_s20  ;;  %v731_v7 = vrot.slane %v2011_v0, 1 }
  0xbf   : > { %v894_v24 = vpop.permute.xlu0 %893 }
  0xc0   : > { %v896_v3 = vpop.permute.xlu1 %895  ;;  %v1174_v43 = vsel %vm1168_vm8, %v1141_v41, %v894_v24 }
  0xc1   : > { %790 = vrot.lane.b32.xlu0 %v2381_v28, %s2080_s18  ;;  %v1176_v56 = vsel %vm1168_vm8, %v1143_v55, %v896_v3  ;;  %v638_v3 = vrot.slane %v636_v22, 1 }
  0xc2   : > { %792 = vrot.lane.b32.xlu1 %v2421_v10, %s2080_s18 }
  0xc3   : > { %v941_v34 = vpop.permute.xlu0 %940  ;;  %v639_v37 = vsel %vm459_vm1, %v634_v26, %v638_v3 }
  0xc4   : > { %v943_v38 = vpop.permute.xlu1 %942  ;;  %v1207_v47 = vsel %vm1201_vm9, %v1174_v43, %v941_v34  ;;  %v728_v34 = vrot.slane %v2009_v16, 1 }
  0xc5   : > { %837 = vrot.lane.b32.xlu0 %v603_v4, %s2084_s22  ;;  %v1209_v57 = vsel %vm1201_vm9, %v1176_v56, %v943_v38  ;;  %v627_v4 = vsel %vm459_vm1, %v622_v59, %v626_v61  ;;  %v643_v38 = vshll.u32 %v2492_v29, 16  ;;  %v650_v61 = vrot.slane %v648_v51, 1 }
  0xc6   : > { %839 = vrot.lane.b32.xlu1 %v615_v35, %s2084_s22  ;;  %v729_v45 = vsel %vm684_vm0, %v727_v33, %v728_v34 }
  0xc7   : > { %v976_v50 = vpop.permute.xlu0 %975 }
  0xc8   : > { %v661_v53 = vpop.permute.xlu1 %660  ;;  %v1240_v54 = vsel %vm1234_vm10, %v1207_v47, %v976_v50 }
  0xc9   : > { %872 = vrot.lane.b32.xlu0 %v720_v12, %s2081_s19  ;;  %1877 = vmatprep.mubr.msk.bf16.mxu0 %vm1294_vm11, %v1240_v54  ;;  %v1013_v32 = vsel %vm1003_vm3, %v2243_v48, %v661_v53 }
  0xca   : > { %874 = vrot.lane.b32.xlu1 %v723_v44, %s2081_s19 }
  0xcb   : > { %v978_v58 = vpop.permute.xlu0 %977 }
  0xcc   : > { %v663_v62 = vpop.permute.xlu1 %662  ;;  %v1242_v63 = vsel %vm1234_vm10, %v1209_v57, %v978_v58 }
  0xcd   : > { %909 = vrot.lane.b32.xlu0 %v2421_v10, %s2085_s23  ;;  %1878 = vmatmul.mubr.msk.bf16.gmra.mxu0 %vm1294_vm11, %v1242_v63  ;;  %v1015_v41 = vsel %vm1003_vm3, %v2262_v60, %v663_v62  ;;  %v645_v60 = vrot.slane %v643_v38, 1 }
  0xce   : > { %911 = vrot.lane.b32.xlu1 %v2434_v27, %s2085_s23 }
  0xcf   : > { %v742_v2 = vpop.permute.xlu0 %741  ;;  %v646_v59 = vor.u32 %v645_v60, %v641_v46 }
  0xd0   : > { %v744_v5 = vpop.permute.xlu1 %743  ;;  %v1046_v1 = vsel %vm1036_vm4, %v1013_v32, %v742_v2  ;;  %v2014_v32 = vld [vmem:[%s2184_s17 + $0xcc] sm:$0xff]  }
  0xd1   : > { %956 = vrot.lane.b32.xlu0 %v615_v35, %s2086_s29  ;;  %v1048_v43 = vsel %vm1036_vm4, %v1015_v41, %v744_v5 }
  0xd2   : > { %958 = vrot.lane.b32.xlu1 %v627_v4, %s2086_s29 }
  0xd3   : > { %v779_v8 = vpop.permute.xlu0 %778 }
  0xd4   : > { %v781_v12 = vpop.permute.xlu1 %780 }
  0xd5   : > { %991 = vrot.lane.b32.xlu0 %v723_v44, %s2087_s15  ;;  %v1081_v47 = vsel %vm1069_vm5, %v1048_v43, %v781_v12  ;;  %v2537_v12 = vld [vmem:[%s2184_s17 + $0xc0] sm:$0xff]  }
  0xd6   : > { %676 = vrot.lane.b32.xlu1 %v615_v35, %s2083_s21  ;;  %v1079_v35 = vsel %vm1069_vm5, %v1046_v1, %v779_v8  ;;  %v806_v21 = vshrl.u32 %v2537_v12, 16 }
  0xd7   : > { %v826_v15 = vpop.permute.xlu0 %825 }
  0xd8   : > { %v828_v18 = vpop.permute.xlu1 %827  ;;  %v1112_v48 = vsel %vm1102_vm6, %v1079_v35, %v826_v15  ;;  %v732_v15 = vsel %vm684_vm0, %v730_v6, %v731_v7  ;;  %v849_v35 = vrot.slane %v2537_v12, 1 }
  0xd9   : > { %993 = vrot.lane.b32.xlu0 %v726_v13, %s2087_s15  ;;  %v1114_v52 = vsel %vm1102_vm6, %v1081_v47, %v828_v18  ;;  %v808_v18 = vshll.u32 %v2537_v12, 16  ;;  %v925_v47 = vshrl.u32 %v2014_v32, 16 }
  0xda   : > { %678 = vrot.lane.b32.xlu1 %v627_v4, %s2083_s21 }
  0xdb   : > { %v861_v19 = vpop.permute.xlu0 %860  ;;  %v810_v22 = vrot.slane %v808_v18, 1 }
  0xdc   : > { %v863_v24 = vpop.permute.xlu1 %862  ;;  %v1145_v42 = vsel %vm1135_vm7, %v1112_v48, %v861_v19  ;;  %v2015_v48 = vld [vmem:[%s2184_s17 + $0xd4] ss:$0 sps:$4 sm:$0x11]   ;;  %s270_s17 = scalar_lea.vmem [#allocation2], %s269_s14 }
  0xdd   : > { %757 = vrot.lane.b32.xlu0 %v723_v44, %s2082_s20  ;;  %v1147_v55 = vsel %vm1135_vm7, %v1114_v52, %v863_v24  ;;  %v813_v24 = vshll.u32 %v2013_v17, 16  ;;  %v811_v3 = vor.u32 %v810_v22, %v806_v21  ;;  %v969_v6 = vrot.slane %v2015_v48, 1 }
  0xde   : > { %759 = vrot.lane.b32.xlu1 %v726_v13, %s2082_s20 }
  0xdf   : > { %v898_v25 = vpop.permute.xlu0 %897 }
  0xe0   : > { %v900_v31 = vpop.permute.xlu1 %899  ;;  %v1178_v44 = vsel %vm1168_vm8, %v1145_v42, %v898_v25 }
  0xe1   : > { %794 = vrot.lane.b32.xlu0 %v2434_v27, %s2080_s18  ;;  %v1180_v56 = vsel %vm1168_vm8, %v1147_v55, %v900_v31  ;;  %v815_v31 = vrot.slane %v813_v24, 1 }
  0xe2   : > { %796 = vrot.lane.b32.xlu1 %v2479_v11, %s2080_s18 }
  0xe3   : > { %v945_v36 = vpop.permute.xlu0 %944  ;;  %v816_v38 = vsel %vm459_vm1, %v811_v3, %v815_v31 }
  0xe4   : > { %v947_v40 = vpop.permute.xlu1 %946  ;;  %v1211_v50 = vsel %vm1201_vm9, %v1178_v44, %v945_v36  ;;  %v850_v36 = vrot.slane %v2013_v17, 1 }
  0xe5   : > { %841 = vrot.lane.b32.xlu0 %v627_v4, %s2084_s22  ;;  %v1213_v57 = vsel %vm1201_vm9, %v1180_v56, %v947_v40  ;;  %v651_v4 = vsel %vm459_vm1, %v646_v59, %v650_v61  ;;  %v927_v40 = vshll.u32 %v2014_v32, 16 }
  0xe6   : > { %843 = vrot.lane.b32.xlu1 %v639_v37, %s2084_s22  ;;  %v851_v46 = vsel %vm684_vm0, %v849_v35, %v850_v36 }
  0xe7   : > { %v980_v30 = vpop.permute.xlu0 %979  ;;  %v929_v51 = vrot.slane %v927_v40, 1 }
  0xe8   : > { %v665_v53 = vpop.permute.xlu1 %664  ;;  %v1244_v54 = vsel %vm1234_vm10, %v1211_v50, %v980_v30 }
  0xe9   : > { %876 = vrot.lane.b32.xlu0 %v726_v13, %s2081_s19  ;;  %1881 = vmatprep.mubr.msk.bf16.mxu0 %vm1294_vm11, %v1244_v54  ;;  %v1017_v33 = vsel %vm1003_vm3, %v2287_v14, %v665_v53  ;;  %v930_v59 = vor.u32 %v929_v51, %v925_v47 }
  0xea   : > { %878 = vrot.lane.b32.xlu1 %v729_v45, %s2081_s19 }
  0xeb   : > { %v982_v58 = vpop.permute.xlu0 %981 }
  0xec   : > { %v667_v62 = vpop.permute.xlu1 %666  ;;  %v1246_v63 = vsel %vm1234_vm10, %v1213_v57, %v982_v58 }
  0xed   : > { %913 = vrot.lane.b32.xlu0 %v2479_v11, %s2085_s23  ;;  %1882 = vmatmul.mubr.msk.bf16.gmra.mxu0 %vm1294_vm11, %v1246_v63  ;;  %v1019_v42 = vsel %vm1003_vm3, %v2300_v23, %v667_v62  ;;  %v932_v23 = vshll.u32 %v2015_v48, 16 }
  0xee   : > { %915 = vrot.lane.b32.xlu1 %v2492_v29, %s2085_s23 }
  0xef   : > { %v746_v2 = vpop.permute.xlu0 %745  ;;  %v934_v61 = vrot.slane %v932_v23, 1 }
  0xf0   : > { %v748_v5 = vpop.permute.xlu1 %747  ;;  %v1050_v34 = vsel %vm1036_vm4, %v1017_v33, %v746_v2 }
  0xf1   : > { %960 = vrot.lane.b32.xlu0 %v639_v37, %s2086_s29  ;;  %v1052_v44 = vsel %vm1036_vm4, %v1019_v42, %v748_v5  ;;  %v968_v5 = vrot.slane %v2014_v32, 1 }
  0xf2   : > { %962 = vrot.lane.b32.xlu1 %v651_v4, %s2086_s29 }
  0xf3   : > { %v783_v8 = vpop.permute.xlu0 %782 }
  0xf4   : > { %v785_v13 = vpop.permute.xlu1 %784 }
  0xf5   : > { %995 = vrot.lane.b32.xlu0 %v729_v45, %s2087_s15  ;;  %v1085_v50 = vsel %vm1069_vm5, %v1052_v44, %v785_v13  ;;  %v970_v13 = vsel %vm684_vm0, %v968_v5, %v969_v6 }
  0xf6   : > { %680 = vrot.lane.b32.xlu1 %v639_v37, %s2083_s21  ;;  %v1083_v37 = vsel %vm1069_vm5, %v1050_v34, %v783_v8 }
  0xf7   : > { %v830_v16 = vpop.permute.xlu0 %829 }
  0xf8   : > { %v832_v19 = vpop.permute.xlu1 %831  ;;  %v1116_v14 = vsel %vm1102_vm6, %v1083_v37, %v830_v16 }
  0xf9   : > { %997 = vrot.lane.b32.xlu0 %v732_v15, %s2087_s15  ;;  %v1118_v52 = vsel %vm1102_vm6, %v1085_v50, %v832_v19 }
  0xfa   : > { %682 = vrot.lane.b32.xlu1 %v651_v4, %s2083_s21  ;;  %s2769_s21 = scalar_lea.hbm %s2817_s7, %s1840_s8 }
  0xfb   : > { %v865_v20 = vpop.permute.xlu0 %864 }
  0xfc   : > { %v867_v25 = vpop.permute.xlu1 %866  ;;  %v1149_v43 = vsel %vm1135_vm7, %v1116_v14, %v865_v20 }
  0xfd   : > { %761 = vrot.lane.b32.xlu0 %v729_v45, %s2082_s20  ;;  %v1151_v55 = vsel %vm1135_vm7, %v1118_v52, %v867_v25 }
  0xfe   : > { %763 = vrot.lane.b32.xlu1 %v732_v15, %s2082_s20 }
  0xff   : > { %v902_v26 = vpop.permute.xlu0 %901 }
 0x100   : > { %v904_v1 = vpop.permute.xlu1 %903  ;;  %v1182_v45 = vsel %vm1168_vm8, %v1149_v43, %v902_v26 }
 0x101   : > { %798 = vrot.lane.b32.xlu0 %v2492_v29, %s2080_s18  ;;  %v1184_v56 = vsel %vm1168_vm8, %v1151_v55, %v904_v1 }
 0x102   : > { %800 = vrot.lane.b32.xlu1 %v2537_v12, %s2080_s18  ;;  %s1720_s18 = sshll.u32 %s270_s17, 4  ;;  %s2771_s18 = int_to_ptr.vmem [resolvable:$true] %s1720_s18 }
 0x103   : > { %v949_v0 = vpop.permute.xlu0 %948  ;;  %s2018_s28 = scalar_lea.vmem %s2771_s18, 16 }
 0x104   : > { %v951_v41 = vpop.permute.xlu1 %950  ;;  %v1215_v30 = vsel %vm1201_vm9, %v1182_v45, %v949_v0  ;;  %p2019_p11 = scmp.ne.s32.totalorder %s2771_s18, %s2018_s28 }
 0x105   : > { %845 = vrot.lane.b32.xlu0 %v651_v4, %s2084_s22  ;;  %v1217_v57 = vsel %vm1201_vm9, %v1184_v56, %v951_v41  ;;  %v935_v4 = vsel %vm459_vm1, %v930_v59, %v934_v61 }
 0x106   : > { %847 = vrot.lane.b32.xlu1 %v816_v38, %s2084_s22  ;;  %s1708_s22 = scalar_lea.sflag [#allocation3], %s269_s14  ;;  %p2020_p12 = pnand %p2019_p11, %p2169_p5 }
 0x107   : > { %v984_v60 = vpop.permute.xlu0 %983 }
 0x108   : > { %v669_v53 = vpop.permute.xlu1 %668  ;;  %v1248_v54 = vsel %vm1234_vm10, %v1215_v30, %v984_v60  ;;  %p2021_p13 = pneg %p2020_p12 }
 0x109   : > { %880 = vrot.lane.b32.xlu0 %v732_v15, %s2081_s19  ;;  %1885 = vmatprep.mubr.msk.bf16.mxu0 %vm1294_vm11, %v1248_v54  ;;  %v1021_v21 = vsel %vm1003_vm3, %v2325_v39, %v669_v53 }
 0x10a   : > { %882 = vrot.lane.b32.xlu1 %v851_v46, %s2081_s19 }
 0x10b   : > { %v986_v58 = vpop.permute.xlu0 %985 }
 0x10c   : > { %v671_v62 = vpop.permute.xlu1 %670  ;;  %v1250_v63 = vsel %vm1234_vm10, %v1217_v57, %v986_v58 }
 0x10d   : > { %917 = vrot.lane.b32.xlu0 %v2537_v12, %s2085_s23  ;;  %1886 = vmatmul.mubr.msk.bf16.gmra.mxu0 %vm1294_vm11, %v1250_v63  ;;  %v1023_v31 = vsel %vm1003_vm3, %v2338_v49, %v671_v62 }
 0x10e   : > { %919 = vrot.lane.b32.xlu1 %v2014_v32, %s2085_s23  ;;  %s2090_s23 = smov [#allocation2]  }
 0x10f   : > { %v750_v2 = vpop.permute.xlu0 %749 }
 0x110   : > { %v752_v7 = vpop.permute.xlu1 %751  ;;  %v1054_v22 = vsel %vm1036_vm4, %v1021_v21, %v750_v2 }
 0x111   : > { %964 = vrot.lane.b32.xlu0 %v816_v38, %s2086_s29  ;;  %v1056_v1 = vsel %vm1036_vm4, %v1023_v31, %v752_v7 }
 0x112   : > { %966 = vrot.lane.b32.xlu1 %v935_v4, %s2086_s29  ;;  %s2022_s29 = sshll.u32 %s2090_s23, 4  ;;  %s2023_s29 = int_to_ptr.vmem [resolvable:$false] %s2022_s29 }
 0x113   : > { %v787_v8 = vpop.permute.xlu0 %786  ;;  %s2024_s9 = scalar_lea.vmem %s2023_s29, 32  ;;  %p2025_p0 = scmp.lt.s32.totalorder %s2771_s18, %s2023_s29 }
 0x114   : > { %v789_v15 = vpop.permute.xlu1 %788  ;;  %v1087_v24 = vsel %vm1069_vm5, %v1054_v22, %v787_v8  ;;  %p2026_p1 = scmp.lt.s32.totalorder %s2024_s9, %s2018_s28 }
 0x115   : > { %999 = vrot.lane.b32.xlu0 %v851_v46, %s2087_s15  ;;  %v1089_v34 = vsel %vm1069_vm5, %v1056_v1, %v789_v15 }
 0x116   : > { %1001 = vrot.lane.b32.xlu1 %v970_v13, %s2087_s15  ;;  %p2027_p2 = por %p2026_p1, %p2025_p0 }
 0x117   : > { %v834_v12 = vpop.permute.xlu0 %833 }
 0x118   : > { %v836_v16 = vpop.permute.xlu1 %835  ;;  %v1120_v26 = vsel %vm1102_vm6, %v1087_v24, %v834_v12  ;;  %p2028_p3 = pnand %p2027_p2, %p2021_p13 }
 0x119   : > { %v1122_v36 = vsel %vm1102_vm6, %v1089_v34, %v836_v16 }
 0x11b   : > { %v869_v17 = vpop.permute.xlu0 %868 }
 0x11c   : > { %v871_v18 = vpop.permute.xlu1 %870  ;;  %v1153_v32 = vsel %vm1135_vm7, %v1120_v26, %v869_v17 }
 0x11d   : > { %v1155_v38 = vsel %vm1135_vm7, %v1122_v36, %v871_v18 }
 0x11f   : > { %v906_v19 = vpop.permute.xlu0 %905 }
 0x120   : > { %v908_v20 = vpop.permute.xlu1 %907  ;;  %v1186_v33 = vsel %vm1168_vm8, %v1153_v32, %v906_v19 }
 0x121   : > { %v1188_v49 = vsel %vm1168_vm8, %v1155_v38, %v908_v20 }
 0x123   : > { %v953_v25 = vpop.permute.xlu0 %952 }
 0x124   : > { %v955_v3 = vpop.permute.xlu1 %954  ;;  %v1219_v39 = vsel %vm1201_vm9, %v1186_v33, %v953_v25 }
 0x125   : > { %v1221_v48 = vsel %vm1201_vm9, %v1188_v49, %v955_v3 }
 0x127   : > { %v988_v35 = vpop.permute.xlu0 %987 }
 0x128   : > { %v673_v37 = vpop.permute.xlu1 %672  ;;  %v1252_v0 = vsel %vm1234_vm10, %v1219_v39, %v988_v35 }
 0x129   : > { %1889 = vmatprep.mubr.msk.bf16.mxu0 %vm1294_vm11, %v1252_v0  ;;  %v1025_v23 = vsel %vm1003_vm3, %v2363_v9, %v673_v37 }
 0x12b   : > { %v990_v40 = vpop.permute.xlu0 %989 }
 0x12c   : > { %v675_v14 = vpop.permute.xlu1 %674  ;;  %v1254_v41 = vsel %vm1234_vm10, %v1221_v48, %v990_v40 }
 0x12d   : > { %1890 = vmatmul.mubr.msk.bf16.gmra.mxu0 %vm1294_vm11, %v1254_v41  ;;  %v1027_v57 = vsel %vm1003_vm3, %v2381_v28, %v675_v14 }
 0x12f   : > { %v754_v42 = vpop.permute.xlu0 %753 }
 0x130   : > { %v756_v43 = vpop.permute.xlu1 %755  ;;  %v1058_v52 = vsel %vm1036_vm4, %v1025_v23, %v754_v42 }
 0x131   : > { %v1060_v59 = vsel %vm1036_vm4, %v1027_v57, %v756_v43 }
 0x133   : > { %v791_v44 = vpop.permute.xlu0 %790 }
 0x134   : > { %v793_v45 = vpop.permute.xlu1 %792  ;;  %v1091_v53 = vsel %vm1069_vm5, %v1058_v52, %v791_v44 }
 0x135   : > { %v1093_v62 = vsel %vm1069_vm5, %v1060_v59, %v793_v45 }
 0x137   : > { %v838_v46 = vpop.permute.xlu0 %837 }
 0x138   : > { %v840_v47 = vpop.permute.xlu1 %839  ;;  %v1124_v55 = vsel %vm1102_vm6, %v1091_v53, %v838_v46 }
 0x139   : > { %v1126_v2 = vsel %vm1102_vm6, %v1093_v62, %v840_v47 }
 0x13b   : > { %v873_v50 = vpop.permute.xlu0 %872 }
 0x13c   : > { %v875_v30 = vpop.permute.xlu1 %874  ;;  %v1157_v58 = vsel %vm1135_vm7, %v1124_v55, %v873_v50 }
 0x13d   : > { %v1159_v6 = vsel %vm1135_vm7, %v1126_v2, %v875_v30 }
 0x13f   : > { %v910_v60 = vpop.permute.xlu0 %909 }
 0x140   : > { %v912_v51 = vpop.permute.xlu1 %911  ;;  %v1190_v61 = vsel %vm1168_vm8, %v1157_v58, %v910_v60 }
 0x141   : > { %v1192_v28 = vsel %vm1168_vm8, %v1159_v6, %v912_v51 }
 0x143   : > { %v957_v54 = vpop.permute.xlu0 %956 }
 0x144   : > { %v959_v56 = vpop.permute.xlu1 %958  ;;  %v1223_v9 = vsel %vm1201_vm9, %v1190_v61, %v957_v54 }
 0x145   : > { %v1225_v7 = vsel %vm1201_vm9, %v1192_v28, %v959_v56 }
 0x147   : > { %v992_v63 = vpop.permute.xlu0 %991 }
 0x148   : > { %v677_v4 = vpop.permute.xlu1 %676  ;;  %v1256_v5 = vsel %vm1234_vm10, %v1223_v9, %v992_v63 }
 0x149   : > { %1893 = vmatprep.mubr.msk.bf16.mxu1 %vm1294_vm11, %v1256_v5  ;;  %v1029_v26 = vsel %vm1003_vm3, %v2421_v10, %v677_v4 }
 0x14b   : > { %v994_v8 = vpop.permute.xlu0 %993 }
 0x14c   : > { %v679_v13 = vpop.permute.xlu1 %678  ;;  %v1258_v15 = vsel %vm1234_vm10, %v1225_v7, %v994_v8 }
 0x14d   : > { %1894 = vmatmul.mubr.msk.bf16.vlgmr.msra.gmra.mxu1 %vm1294_vm11, %v1258_v15  ;;  %v1031_v34 = vsel %vm1003_vm3, %v2434_v27, %v679_v13 }
 0x14f   : > { %v758_v12 = vpop.permute.xlu0 %757 }
 0x150   : > { %v760_v16 = vpop.permute.xlu1 %759  ;;  %v1062_v3 = vsel %vm1036_vm4, %v1029_v26, %v758_v12  ;;  %v1594_v12 = vld [vmem:[%s2813_s3] sm:$0xf] }
 0x151   : > { %v1064_v35 = vsel %vm1036_vm4, %v1031_v34, %v760_v16  ;;  %v2088_v16 = vmov 0.0  }
 0x152   : > { %1905 = vmatprep.subr.bf16.mxu1 %v2088_v16 }
 0x153   : > { %v795_v17 = vpop.permute.xlu0 %794 }
 0x154   : > { %v797_v18 = vpop.permute.xlu1 %796  ;;  %v1095_v31 = vsel %vm1069_vm5, %v1062_v3, %v795_v17  ;;  %v1601_v17 = vsel %vm1599_vm12, %v1594_v12, 0 }
 0x155   : > { %v1097_v37 = vsel %vm1069_vm5, %v1064_v35, %v797_v18  ;;  %1906 = vmatpush3.bf16.msra.mxu1 %v1601_v17 }
 0x156   : > { %1911 = vmatprep.subr.bf16.mxu1 %v2088_v16 }
 0x157   : > { %v842_v19 = vpop.permute.xlu0 %841 }
 0x158   : > { %v844_v20 = vpop.permute.xlu1 %843  ;;  %v1128_v1 = vsel %vm1102_vm6, %v1095_v31, %v842_v19 }
 0x159   : > { %v1130_v38 = vsel %vm1102_vm6, %v1097_v37, %v844_v20 }
 0x15b   : > { %v877_v21 = vpop.permute.xlu0 %876 }
 0x15c   : > { %v879_v22 = vpop.permute.xlu1 %878  ;;  %v1161_v39 = vsel %vm1135_vm7, %v1128_v1, %v877_v21 }
 0x15d   : > { %v1163_v40 = vsel %vm1135_vm7, %v1130_v38, %v879_v22  ;;  %v2681_v22 = vld [vmem:[%s2812_s2] ss:$0 sm:$0xff] }
 0x15f   : > { %v914_v24 = vpop.permute.xlu0 %913 }
 0x160   : > { %v916_v25 = vpop.permute.xlu1 %915  ;;  %v1194_v36 = vsel %vm1168_vm8, %v1161_v39, %v914_v24 }
 0x161   : > { %v1196_v27 = vsel %vm1168_vm8, %v1163_v40, %v916_v25 }
 0x163   : > { %v961_v32 = vpop.permute.xlu0 %960 }
 0x164   : > { %v963_v33 = vpop.permute.xlu1 %962  ;;  %v1227_v10 = vsel %vm1201_vm9, %v1194_v36, %v961_v32 }
 0x165   : > { %v1229_v14 = vsel %vm1201_vm9, %v1196_v27, %v963_v33 }
 0x167   : > { %v996_v0 = vpop.permute.xlu0 %995 }
 0x168   : > { %v681_v49 = vpop.permute.xlu1 %680  ;;  %v1260_v48 = vsel %vm1234_vm10, %v1227_v10, %v996_v0 }
 0x169   : > { %1897 = vmatprep.mubr.msk.bf16.mxu1 %vm1294_vm11, %v1260_v48  ;;  %v1033_v53 = vsel %vm1003_vm3, %v2479_v11, %v681_v49 }
 0x16b   : > { %v998_v41 = vpop.permute.xlu0 %997 }
 0x16c   : > { %v683_v42 = vpop.permute.xlu1 %682  ;;  %v1262_v43 = vsel %vm1234_vm10, %v1229_v14, %v998_v41 }
 0x16d   : > { %1898 = vmatmul.mubr.msk.bf16.gmra.mxu1 %vm1294_vm11, %v1262_v43  ;;  %v1035_v54 = vsel %vm1003_vm3, %v2492_v29, %v683_v42  ;;  %v1875_v13 = vpop.f32.mrf.mxu0 }
 0x16e   : > { %v1374_v1 = vadd.f32 %v1875_v13, %v2681_v22 }
 0x16f   : > { %v762_v44 = vpop.permute.xlu0 %761  ;;  %v1365_v15 = vpop.f32.mrf.mxu0 }
 0x170   : > { %v764_v45 = vpop.permute.xlu1 %763  ;;  %v1066_v55 = vsel %vm1036_vm4, %v1033_v53, %v762_v44  ;;  %v1366_v26 = vadd.f32 %v2681_v22, %v1365_v15  ;;  %v1494_v35 = vmax.f32 %v1374_v1, 0.0 }
 0x171   : > { %v1068_v56 = vsel %vm1036_vm4, %v1035_v54, %v764_v45  ;;  %v1876_v18 = vpop.f32.mrf.mxu0 }
 0x172   : > { %v1492_v33 = vmax.f32 %v1366_v26, 0.0  ;;  %v1377_v37 = vadd.f32 %v1876_v18, %v2681_v22  ;;  %v1527_v48 = vsel %vm1036_vm4, %v1494_v35, 0.0 }
 0x173   : > { %v799_v46 = vpop.permute.xlu0 %798  ;;  %v1368_v19 = vpop.f32.mrf.mxu0 }
 0x174   : > { %v801_v47 = vpop.permute.xlu1 %800  ;;  %v1099_v57 = vsel %vm1069_vm5, %v1066_v55, %v799_v46  ;;  %v1369_v25 = vadd.f32 %v2681_v22, %v1368_v19  ;;  %v1524_v36 = vsel %vm1036_vm4, %v1492_v33, 0.0  ;;  %v1495_v40 = vmax.f32 %v1377_v37, 0.0 }
 0x175   : > { %v1101_v59 = vsel %vm1069_vm5, %v1068_v56, %v801_v47 }
 0x176   : > { %v1493_v31 = vmax.f32 %v1369_v25, 0.0  ;;  %v1529_v43 = vsel %vm1036_vm4, %v1495_v40, 0.0 }
 0x177   : > { %v846_v50 = vpop.permute.xlu0 %845 }
 0x178   : > { %v848_v30 = vpop.permute.xlu1 %847  ;;  %v1132_v61 = vsel %vm1102_vm6, %v1099_v57, %v846_v50  ;;  %v1525_v34 = vsel %vm1036_vm4, %v1493_v31, 0.0 }
 0x179   : > { %v1134_v9 = vsel %vm1102_vm6, %v1101_v59, %v848_v30  ;;  %v1526_v0 = vadd.f32 %v1525_v34, %v1524_v36 }
 0x17b   : > { %v881_v60 = vpop.permute.xlu0 %880  ;;  %v1528_v14 = vadd.f32 %v1527_v48, %v1526_v0 }
 0x17c   : > { %v883_v51 = vpop.permute.xlu1 %882  ;;  %v1165_v63 = vsel %vm1135_vm7, %v1132_v61, %v881_v60 }
 0x17d   : > { %v1167_v11 = vsel %vm1135_vm7, %v1134_v9, %v883_v51  ;;  %v1530_v46 = vadd.f32 %v1529_v43, %v1528_v14 }
 0x17f   : > { %v918_v23 = vpop.permute.xlu0 %917 }
 0x180   : > { %v920_v52 = vpop.permute.xlu1 %919  ;;  %v1198_v29 = vsel %vm1168_vm8, %v1165_v63, %v918_v23 }
 0x181   : > { %v1200_v2 = vsel %vm1168_vm8, %v1167_v11, %v920_v52 }
 0x183   : > { %v965_v58 = vpop.permute.xlu0 %964 }
 0x184   : > { %v967_v62 = vpop.permute.xlu1 %966  ;;  %v1231_v4 = vsel %vm1201_vm9, %v1198_v29, %v965_v58 }
 0x185   : > { %v1233_v6 = vsel %vm1201_vm9, %v1200_v2, %v967_v62 }
 0x187   : > { %v1000_v5 = vpop.permute.xlu0 %999 }
 0x188   : > { %v1002_v28 = vpop.permute.xlu1 %1001  ;;  %v1264_v7 = vsel %vm1234_vm10, %v1231_v4, %v1000_v5 }
 0x189   : > { %v1266_v8 = vsel %vm1234_vm10, %v1233_v6, %v1002_v28  ;;  %1901 = vmatprep.mubr.msk.bf16.mxu1 %vm1294_vm11, %v1264_v7 }
 0x18a   : > { %1902 = vmatmul.mubr.msk.bf16.gmra.mxu1 %vm1294_vm11, %v1266_v8 }
 0x18b   : > { %1907 = vmatprep.mubr.msk.bf16.mxu1 %vm2089_vm13, %v2088_v16 }
 0x18d   : > { %v1879_v20 = vpop.f32.mrf.mxu0 }
 0x18e   : > { %v1390_v44 = vadd.f32 %v1879_v20, %v2681_v22 }
 0x18f   : > { %v1381_v21 = vpop.f32.mrf.mxu0 }
 0x190   : > { %v1382_v10 = vadd.f32 %v2681_v22, %v1381_v21  ;;  %v1498_v60 = vmax.f32 %v1390_v44, 0.0 }
 0x191   : > { %v1880_v24 = vpop.f32.mrf.mxu0 }
 0x192   : > { %v1496_v27 = vmax.f32 %v1382_v10, 0.0  ;;  %v1393_v51 = vadd.f32 %v1880_v24, %v2681_v22  ;;  %v1535_v55 = vsel %vm1036_vm4, %v1498_v60, 0.0 }
 0x193   : > { %v1384_v3 = vpop.f32.mrf.mxu0 }
 0x194   : > { %v1385_v38 = vadd.f32 %v2681_v22, %v1384_v3  ;;  %v1531_v45 = vsel %vm1036_vm4, %v1496_v27, 0.0  ;;  %v1499_v56 = vmax.f32 %v1393_v51, 0.0 }
 0x195   : > { %v1532_v30 = vadd.f32 %v1531_v45, %v1530_v46 }
 0x196   : > { %v1497_v41 = vmax.f32 %v1385_v38, 0.0  ;;  %v1537_v62 = vsel %vm1036_vm4, %v1499_v56, 0.0 }
 0x198   : > { %v1533_v50 = vsel %vm1036_vm4, %v1497_v41, 0.0 }
 0x199   : > { %v1534_v52 = vadd.f32 %v1533_v50, %v1532_v30 }
 0x19b   : > { %v1536_v58 = vadd.f32 %v1535_v55, %v1534_v52 }
 0x19d   : > { %v1538_v11 = vadd.f32 %v1537_v62, %v1536_v58 }
 0x1ad   : > { %v1883_v32 = vpop.f32.mrf.mxu0 }
 0x1ae   : > { %v1406_v9 = vadd.f32 %v1883_v32, %v2681_v22 }
 0x1af   : > { %v1397_v39 = vpop.f32.mrf.mxu0 }
 0x1b0   : > { %v1398_v23 = vadd.f32 %v2681_v22, %v1397_v39  ;;  %v1502_v6 = vmax.f32 %v1406_v9, 0.0 }
 0x1b1   : > { %v1884_v49 = vpop.f32.mrf.mxu0 }
 0x1b2   : > { %v1500_v57 = vmax.f32 %v1398_v23, 0.0  ;;  %v1409_v28 = vadd.f32 %v1884_v49, %v2681_v22  ;;  %v1543_v12 = vsel %vm1036_vm4, %v1502_v6, 0.0 }
 0x1b3   : > { %v1400_v42 = vpop.f32.mrf.mxu0 }
 0x1b4   : > { %v1401_v54 = vadd.f32 %v2681_v22, %v1400_v42  ;;  %v1539_v63 = vsel %vm1036_vm4, %v1500_v57, 0.0  ;;  %v1503_v17 = vmax.f32 %v1409_v28, 0.0 }
 0x1b5   : > { %v1540_v4 = vadd.f32 %v1539_v63, %v1538_v11 }
 0x1b6   : > { %v1501_v61 = vmax.f32 %v1401_v54, 0.0  ;;  %v1545_v24 = vsel %vm1036_vm4, %v1503_v17, 0.0 }
 0x1b8   : > { %v1541_v2 = vsel %vm1036_vm4, %v1501_v61, 0.0 }
 0x1b9   : > { %v1542_v8 = vadd.f32 %v1541_v2, %v1540_v4 }
 0x1bb   : > { %v1544_v19 = vadd.f32 %v1543_v12, %v1542_v8 }
 0x1bd   : > { %v1546_v3 = vadd.f32 %v1545_v24, %v1544_v19 }
 0x1cd   : > { %v1887_v47 = vpop.f32.mrf.mxu0 }
 0x1ce   : > { %v1422_v25 = vadd.f32 %v1887_v47, %v2681_v22 }
 0x1cf   : > { %v1413_v53 = vpop.f32.mrf.mxu0 }
 0x1d0   : > { %v1414_v7 = vadd.f32 %v2681_v22, %v1413_v53  ;;  %v1506_v34 = vmax.f32 %v1422_v25, 0.0 }
 0x1d1   : > { %v1888_v59 = vpop.f32.mrf.mxu0 }
 0x1d2   : > { %v1504_v18 = vmax.f32 %v1414_v7, 0.0  ;;  %v1425_v39 = vadd.f32 %v1888_v59, %v2681_v22  ;;  %v1551_v0 = vsel %vm1036_vm4, %v1506_v34, 0.0 }
 0x1d3   : > { %v1416_v29 = vpop.f32.mrf.mxu0 }
 0x1d4   : > { %v1417_v13 = vadd.f32 %v2681_v22, %v1416_v29  ;;  %v1547_v26 = vsel %vm1036_vm4, %v1504_v18, 0.0  ;;  %v1507_v38 = vmax.f32 %v1425_v39, 0.0 }
 0x1d5   : > { %v1548_v1 = vadd.f32 %v1547_v26, %v1546_v3 }
 0x1d6   : > { %v1505_v20 = vmax.f32 %v1417_v13, 0.0  ;;  %v1553_v14 = vsel %vm1036_vm4, %v1507_v38, 0.0 }
 0x1d8   : > { %v1549_v32 = vsel %vm1036_vm4, %v1505_v20, 0.0 }
 0x1d9   : > { %v1550_v36 = vadd.f32 %v1549_v32, %v1548_v1 }
 0x1db   : > { %v1552_v48 = vadd.f32 %v1551_v0, %v1550_v36 }
 0x1dd   : > { %v1554_v43 = vadd.f32 %v1553_v14, %v1552_v48 }
 0x1ed   : > { %v1891_v5 = vpop.f32.mrf.mxu0 }
 0x1ee   : > { %v1438_v41 = vadd.f32 %v1891_v5, %v2681_v22 }
 0x1ef   : > { %v1429_v15 = vpop.f32.mrf.mxu0 }
 0x1f0   : > { %v1430_v35 = vadd.f32 %v2681_v22, %v1429_v15  ;;  %v1510_v50 = vmax.f32 %v1438_v41, 0.0 }
 0x1f1   : > { %v1892_v21 = vpop.f32.mrf.mxu0 }
 0x1f2   : > { %v1508_v49 = vmax.f32 %v1430_v35, 0.0  ;;  %v1441_v30 = vadd.f32 %v1892_v21, %v2681_v22  ;;  %v1559_v53 = vsel %vm1036_vm4, %v1510_v50, 0.0 }
 0x1f3   : > { %v1432_v33 = vpop.f32.mrf.mxu0 }
 0x1f4   : > { %v1433_v10 = vadd.f32 %v2681_v22, %v1432_v33  ;;  %v1555_v42 = vsel %vm1036_vm4, %v1508_v49, 0.0  ;;  %v1511_v54 = vmax.f32 %v1441_v30, 0.0 }
 0x1f5   : > { %v1556_v46 = vadd.f32 %v1555_v42, %v1554_v43 }
 0x1f6   : > { %v1509_v27 = vmax.f32 %v1433_v10, 0.0  ;;  %v1561_v59 = vsel %vm1036_vm4, %v1511_v54, 0.0 }
 0x1f8   : > { %v1557_v45 = vsel %vm1036_vm4, %v1509_v27, 0.0 }
 0x1f9   : > { %v1558_v51 = vadd.f32 %v1557_v45, %v1556_v46 }
 0x1fb   : > { %v1560_v56 = vadd.f32 %v1559_v53, %v1558_v51  ;;  %v2016_v53 = vld [vmem:[%s2815_s5 + $0x8] sm:$0xff]  }
 0x1fd   : > { %v1562_v9 = vadd.f32 %v1561_v59, %v1560_v56  ;;  %v1595_v56 = vld [vmem:[%s2814_s4] sm:$0x1] }
 0x20d   : > { %v1895_v31 = vpop.f32.mrf.mxu1 }
 0x20e   : > { %v1454_v61 = vadd.f32 %v1895_v31, %v2681_v22 }
 0x20f   : > { %v1445_v37 = vpop.f32.mrf.mxu1 }
 0x210   : > { %v1446_v60 = vadd.f32 %v2681_v22, %v1445_v37  ;;  %v1514_v2 = vmax.f32 %v1454_v61, 0.0 }
 0x211   : > { %v1896_v40 = vpop.f32.mrf.mxu1 }
 0x212   : > { %v1512_v55 = vmax.f32 %v1446_v60, 0.0  ;;  %v1457_v4 = vadd.f32 %v1896_v40, %v2681_v22  ;;  %v1567_v7 = vsel %vm1036_vm4, %v1514_v2, 0.0 }
 0x213   : > { %v1448_v44 = vpop.f32.mrf.mxu1 }
 0x214   : > { %v1449_v23 = vadd.f32 %v2681_v22, %v1448_v44  ;;  %v1563_v62 = vsel %vm1036_vm4, %v1512_v55, 0.0  ;;  %v1515_v8 = vmax.f32 %v1457_v4, 0.0  ;;  %v2017_v55 = vld [vmem:[%s2815_s5] sm:$0xff]  }
 0x215   : > { %v1564_v11 = vadd.f32 %v1563_v62, %v1562_v9 }
 0x216   : > { %v1513_v57 = vmax.f32 %v1449_v23, 0.0  ;;  %v1569_v17 = vsel %vm1036_vm4, %v1515_v8, 0.0 }
 0x218   : > { %v1565_v63 = vsel %vm1036_vm4, %v1513_v57, 0.0 }
 0x219   : > { %v1566_v6 = vadd.f32 %v1565_v63, %v1564_v11 }
 0x21b   : > { %v1568_v15 = vadd.f32 %v1567_v7, %v1566_v6 }
 0x21d   : > { %v1570_v20 = vadd.f32 %v1569_v17, %v1568_v15 }
 0x22d   : > { %v1899_v47 = vpop.f32.mrf.mxu1 }
 0x22e   : > { %v1470_v18 = vadd.f32 %v1899_v47, %v2681_v22 }
 0x22f   : > { %v1461_v52 = vpop.f32.mrf.mxu1 }
 0x230   : > { %v1462_v5 = vadd.f32 %v2681_v22, %v1461_v52  ;;  %v1518_v25 = vmax.f32 %v1470_v18, 0.0 }
 0x231   : > { %v1900_v58 = vpop.f32.mrf.mxu1 }
 0x232   : > { %v1516_v13 = vmax.f32 %v1462_v5, 0.0  ;;  %v1473_v26 = vadd.f32 %v1900_v58, %v2681_v22  ;;  %v1575_v1 = vsel %vm1036_vm4, %v1518_v25, 0.0 }
 0x233   : > { %v1464_v29 = vpop.f32.mrf.mxu1 }
 0x234   : > { %v1465_v28 = vadd.f32 %v2681_v22, %v1464_v29  ;;  %v1571_v19 = vsel %vm1036_vm4, %v1516_v13, 0.0  ;;  %v1519_v33 = vmax.f32 %v1473_v26, 0.0 }
 0x235   : > { %v1572_v24 = vadd.f32 %v1571_v19, %v1570_v20 }
 0x236   : > { %v1517_v12 = vmax.f32 %v1465_v28, 0.0  ;;  %v1577_v0 = vsel %vm1036_vm4, %v1519_v33, 0.0 }
 0x238   : > { %v1573_v21 = vsel %vm1036_vm4, %v1517_v12, 0.0 }
 0x239   : > { %v1574_v3 = vadd.f32 %v1573_v21, %v1572_v24 }
 0x23b   : > { %v1576_v39 = vadd.f32 %v1575_v1, %v1574_v3 }
 0x23d   : > { %v1578_v40 = vadd.f32 %v1577_v0, %v1576_v39 }
 0x24a   : > { %v1903_v31 = vpop.f32.mrf.mxu1 }
 0x24b   : > { %v1486_v36 = vadd.f32 %v1903_v31, %v2681_v22 }
 0x24c   : > { %v1477_v32 = vpop.f32.mrf.mxu1 }
 0x24d   : > { %v1478_v34 = vadd.f32 %v2681_v22, %v1477_v32  ;;  %v1522_v27 = vmax.f32 %v1486_v36, 0.0 }
 0x24e   : > { %v1904_v35 = vpop.f32.mrf.mxu1 }
 0x24f   : > { %v1520_v37 = vmax.f32 %v1478_v34, 0.0  ;;  %v1489_v49 = vadd.f32 %v1904_v35, %v2681_v22  ;;  %v1583_v45 = vsel %vm1036_vm4, %v1522_v27, 0.0 }
 0x250   : > { %v1480_v10 = vpop.f32.mrf.mxu1 }
 0x251   : > { %v1579_v38 = vsel %vm1036_vm4, %v1520_v37, 0.0  ;;  %v1481_v48 = vadd.f32 %v2681_v22, %v1480_v10  ;;  %v1523_v42 = vmax.f32 %v1489_v49, 0.0 }
 0x252   : > { %v1580_v41 = vadd.f32 %v1579_v38, %v1578_v40 }
 0x253   : > { %v1521_v14 = vmax.f32 %v1481_v48, 0.0  ;;  %v1585_v47 = vsel %vm1036_vm4, %v1523_v42, 0.0 }
 0x255   : > { %v1581_v43 = vsel %vm1036_vm4, %v1521_v14, 0.0 }
 0x256   : > { %v1582_v44 = vadd.f32 %v1581_v43, %v1580_v41 }
 0x258   : > { %v1584_v46 = vadd.f32 %v1583_v45, %v1582_v44 }
 0x25a   : > { %v1586_v50 = vadd.f32 %v1585_v47, %v1584_v46 }
 0x25c   : > { %v1587_v30 = vrot.slane %v1586_v50, 4 }
 0x25e   : > { %v1588_v60 = vadd.f32 %v1587_v30, %v1586_v50 }
 0x260   : > { %v1589_v51 = vrot.slane %v1588_v60, 2 }
 0x262   : > { %v1590_v23 = vadd.f32 %v1589_v51, %v1588_v60 }
 0x264   : > { %v1591_v52 = vrot.slane %v1590_v23, 1 }
 0x266   : > { %v1592_v22 = vadd.f32 %v1591_v52, %v1590_v23 }
 0x268   : > { %v1593_v54 = vpack.c.bf16 %v1592_v22, %v1592_v22 }
 0x26a   : > { %1908 = vmatmul.mubr.msk.bf16.vlgmr.msra.gmra.mxu1 %vm1036_vm4, %v1593_v54 }
 0x26b   : > { %1912 = vmatpush3.bf16.msra.mxu1 %v2016_v53  ;;  %1915 = vmatprep.mubr.msk.bf16.mxu1 %vm2089_vm13, %v2088_v16 }
 0x26c   : > { %1913 = vmatprep.subr.bf16.mxu1 %v2088_v16  ;;  %v1649_v16 = vld [vmem:[%s2816_s6] sm:$0x1] }
 0x26f   : > { %1914 = vmatpush3.bf16.msra.mxu1 %v2017_v55 }
 0x32a   : > { %v1637_v57 = vpop.f32.mrf.mxu1 }
 0x32b   : > { %v1638_v58 = vadd.f32 %v1637_v57, %v1595_v56 }
 0x32c   : > { %v1909_v59 = vpop.f32.mrf.mxu1 }
 0x32d   : > { %v1643_v61 = vmax.f32 %v1638_v58, 0.0 }
 0x32e   : > { %v1640_v62 = vpop.f32.mrf.mxu1 }
 0x32f   : > { %v1644_v9 = vpack.c.bf16 %v1643_v61, %v1643_v61 }
 0x330   : > { %v1910_v63 = vpop.f32.mrf.mxu1 }
 0x331   : > { %1916 = vmatmul.mubr.msk.bf16.vlgmr.msra.gmra.mxu1 %vm1234_vm10, %v1644_v9 }
 0x3f1   : > { %v1699_v11 = vpop.f32.mrf.mxu1 }
 0x3f2   : > { %v1700_v29 = vadd.f32 %v1699_v11, %v1649_v16 }
 0x3f3   : > { %v1917_v2 = vpop.f32.mrf.mxu1 }
 0x3f4   : > { %1706 = vst.msk [vmem:[%s270_s17] sm:$0x1] %vm1705_vm14, %v1700_v29 }
 0x3f5   : > { %v1702_v4 = vpop.f32.mrf.mxu1 }
 0x3f6   : > { %2031 = shalt.err (!%p2028_p3)
}
 0x3f7   : > { %s2032_s13 = scalar_lea.hbm %s2769_s21, 16  ;;  %s2036_s16 = scalar_lea.hbm %s2817_s7, 32 }
 0x3f8   : > { %p2033_p4 = scmp.ne.s32.totalorder %s2769_s21, %s2032_s13  ;;  %p2037_p9 = scmp.lt.s32.totalorder %s2769_s21, %s2817_s7 }
 0x3f9   : > { %p2038_p10 = scmp.lt.s32.totalorder %s2036_s16, %s2032_s13 }
 0x3fa   : > { %p2034_p7 = pnand %p2033_p4, %p2169_p5 }
 0x3fb   : > { %p2039_p11 = por %p2038_p10, %p2037_p9 }
 0x3fc   : > { %p2035_p8 = pneg %p2034_p7 }
 0x3fe   : > { %p2040_p12 = pnand %p2039_p11, %p2035_p8 }
 0x400   : > { %2043 = shalt.err (!%p2040_p12)
}
 0x401   : > { %1928 = dma.vmem_to_hbm [thread:$0]  (%p2169_p5), %s2771_s18, 16, %s2769_s21, %s1708_s22   ;;  %v1918_v5 = vpop.f32.mrf.mxu1 }
 0x402 PF: > { %p1934_p13 = scmp.ge.s32.totalorder %s2078_s27, 2  ;;  %s1732_s19 = sand.u32 1, %s2066_s24  }
 0x403   : > { %s1733_s20 = scalar_lea.sflag [#allocation3], %s1732_s19 }
 0x404   : > { %p1931_p0 = pnand %p1934_p13, %p2173_p6 }
 0x406   : > { %p1932_p1 = pneg %p1931_p0 }
 0x408   : > { %2061 = dma.done.wait (%p1932_p1), %s1733_s20, 16  }
 0x409   : > { %2063 = vsyncadd (%p1932_p1), %s1733_s20, 4294967280  ;;  %p17_p2 = scmp.ge.s32.totalorder %s2156_s30, 4   ;;  %s2820_s24 = smov %s2070_s25 }
 0x40a   : > { %s2821_s25 = smov %s2074_s26  ;;  %s2822_s26 = smov %s2167_s10 }
 0x40b   : > { %s2823_s27 = smov %s2156_s30  ;;  %19 = sbr.rel (!%p17_p2) target bundleno = 3 (0x3), region = 83 }
 0x410   :  { %1737 = vsyncpa [#allocation3], 1 }
 0x411   :  { %1739 = vsyncpa [#allocation3 + $0x1], 1 }

</bundles_post_ra>
